<compile_context>
chip_gen: v7x
topology: tpu7x:2x2x1
jax: 0.10.0
libtpu: 0.0.40
codegen_flags: <defaults>
</compile_context>

<pallas_src>
import jax
import jax.numpy as jnp
from jax.experimental import pallas as pl
from jax.experimental.pallas import tpu as pltpu


# ----------------------------------------------------------------------------
# Trace-time helpers (XLA preprocessing, run once per call — cheap).
# ----------------------------------------------------------------------------
def im2col_T(x):
    """im2col for a 3x3 / stride-1 / pad-1 conv, transposed layout.

    x: [N, C, H, W] -> [N, C*9, H*W] with feature order (C, kh, kw),
    matching w_conv.reshape(Cout, C*9).
    """
    n, c, h, w = x.shape
    xp = jnp.pad(x, ((0, 0), (0, 0), (1, 1), (1, 1)))
    cols = [xp[:, :, di:di + h, dj:dj + w] for di in range(3) for dj in range(3)]
    patches = jnp.stack(cols, axis=2)            # [N, C, 9, H, W]
    return patches.reshape(n, c * 9, h * w)      # [N, C*9, H*W]


def _patch_positions(H, W, neighbor, pw, plen):
    return [(i, j)
            for i in range(0, H - pw + 1, neighbor)
            for j in range(0, W - plen + 1, neighbor)]


# ----------------------------------------------------------------------------
# Fused Pallas kernel: ONE grid step per image; all P patch positions are
# processed as real MXU rows and pooled in-register.
#
# Layouts (lane axis carries [ub | lb] pairs):
#   colmur2 : [kp1, 2*HW]         [col_mu; col_r; 1 | col_mu; -col_r; 1]
#   wcA     : [Cout, kp1]         [W, |W|, b]  (conv weight, bias folded)
#   mradS   : [Cout, P, 2*HW]     [+eps*(|W| im2col(mask)) | -...]
#   w1f     : [Cout, 2*HW, 2*hid] [[W1+,W1-],[W1-,W1+]] per conv channel
#   w2f     : [2*hid, 2*ns]       [[W2+,-W2-],[W2-,-W2+]] (lb cols negated)
# ----------------------------------------------------------------------------
def _fused_ibp_pool_kernel(colmur2_ref, mradS_ref, wcA_ref, w1f_ref,
                           b1f_ref, w2f_ref, out_ref):
    cout = mradS_ref.shape[0]

    # Position-independent conv base: one MXU matmul producing, per channel,
    # [ub_base | lb_base] side by side on the lane axis.   (Cout, 2*HW)
    base2 = jnp.dot(wcA_ref[...], colmur2_ref[0],
                    preferred_element_type=jnp.float32)

    # fc1 accumulated over conv output channels.  Per channel: finish the
    # conv IBP for ALL positions at once on a (P, 2*HW) tile (add the
    # per-position radius delta, ReLU), then one +-fused MXU matmul.
    acc = None
    for c in range(cout):                                   # static unroll
        act_c = jnp.maximum(base2[c:c + 1, :] + mradS_ref[c], 0.0)  # (P, 2*HW)
        part = jnp.dot(act_c, w1f_ref[c],
                       preferred_element_type=jnp.float32)          # (P, 2*hid)
        acc = part if acc is None else acc + part

    h = jnp.maximum(acc + b1f_ref[...], 0.0)                # (P, 2*hid) = [ub2|lb2]

    # Final linear merged with the specification matrix C (lb columns have
    # their sign flipped at trace time so min-pool folds into the max below).
    out = jnp.dot(h, w2f_ref[...],
                  preferred_element_type=jnp.float32)       # (P, 2*num_spec)

    # Pool over patch positions: single sublane max-reduce, one store.
    out_ref[0] = jnp.max(out, axis=0, keepdims=True)        # (1, 2*num_spec)


# ----------------------------------------------------------------------------
# interval_range_pool: parallel-over-patch-positions IBP + pooling.
# ----------------------------------------------------------------------------
def interval_range_pool(x_U, x_L, eps, C, neighbor, pos_patch_width,
                        pos_patch_length, params):
    B, Cin, H, W = x_U.shape
    HW = H * W
    w_conv = params["w_conv"]
    Cout = w_conv.shape[0]
    hidden = params["w_fc1"].shape[0]
    num_spec = C.shape[0]
    hp = jax.lax.Precision.HIGHEST

    positions = _patch_positions(H, W, neighbor, pos_patch_width,
                                 pos_patch_length)
    P = len(positions)
    masks = jnp.zeros((P, H, W), jnp.float32)
    for idx, (i, j) in enumerate(positions):
        masks = masks.at[idx, i:i + pos_patch_width,
                         j:j + pos_patch_length].set(1.0)

    # Center is identical for every patch position (+/- eps*mask cancels).
    mu = (x_U + x_L) * 0.5
    r0 = (x_U - x_L) * 0.5
    col_mu = im2col_T(mu)                                    # [B, Cin*9, HW]
    col_r = im2col_T(r0)
    ones = jnp.ones((B, 1, HW), jnp.float32)
    col_plus = jnp.concatenate([col_mu, col_r, ones], axis=1)
    col_minus = jnp.concatenate([col_mu, -col_r, ones], axis=1)
    colmur2 = jnp.concatenate([col_plus, col_minus], axis=2)  # [B, kp1, 2*HW]

    w_flat = w_conv.reshape(Cout, Cin * 9)                   # [Cout, Cin*9]
    w_abs = jnp.abs(w_flat)
    wcA = jnp.concatenate(
        [w_flat, w_abs, params["b_conv"].reshape(Cout, 1)], axis=1)  # [Cout, kp1]

    # Per-position conv radius delta (position-only -> precompute for ALL P).
    mask_c = jnp.broadcast_to(masks[:, None, :, :], (P, Cin, H, W))
    col_mask = im2col_T(mask_c)                              # [P, Cin*9, HW]
    mrad = eps * jnp.einsum('ck,pkh->pch', w_abs, col_mask,
                            precision=hp)                    # [P, Cout, HW]
    mradS = jnp.concatenate([mrad, -mrad], axis=2)           # [P, Cout, 2*HW]
    mradS = mradS.transpose(1, 0, 2).astype(jnp.float32)     # [Cout, P, 2*HW]

    # fc1 weights regrouped per conv channel and +-fused (W+ / W-) so the
    # kernel consumes the [ub | lb] conv tiles directly (no flatten, no |W|).
    W1t = params["w_fc1"].T.reshape(Cout, HW, hidden)        # [Cout, HW, hid]
    W1p = jnp.maximum(W1t, 0.0)
    W1n = jnp.minimum(W1t, 0.0)
    w1f = jnp.concatenate(
        [jnp.concatenate([W1p, W1n], axis=2),
         jnp.concatenate([W1n, W1p], axis=2)], axis=1)       # [Cout, 2*HW, 2*hid]
    b1f = jnp.concatenate(
        [params["b_fc1"], params["b_fc1"]]).reshape(1, 2 * hidden)

    # Final linear merged with C; lb columns negated so min-pool == max-pool.
    W2m = jnp.dot(C, params["w_fc2"], precision=hp).T        # [hid, num_spec]
    W2p = jnp.maximum(W2m, 0.0)
    W2n = jnp.minimum(W2m, 0.0)
    w2f = jnp.concatenate(
        [jnp.concatenate([W2p, -W2n], axis=1),
         jnp.concatenate([W2n, -W2p], axis=1)], axis=0)      # [2*hid, 2*ns]
    b2m = jnp.dot(C, params["b_fc2"], precision=hp).reshape(1, num_spec)

    kp1 = 2 * Cin * 9 + 1

    pooled = pl.pallas_call(
        _fused_ibp_pool_kernel,
        out_shape=jax.ShapeDtypeStruct((B, 1, 2 * num_spec), jnp.float32),
        grid_spec=pltpu.PrefetchScalarGridSpec(
            num_scalar_prefetch=0,
            grid=(B,),
            in_specs=[
                pl.BlockSpec((1, kp1, 2 * HW), lambda b: (b, 0, 0)),      # colmur2
                pl.BlockSpec((Cout, P, 2 * HW), lambda b: (0, 0, 0)),     # mradS
                pl.BlockSpec((Cout, kp1), lambda b: (0, 0)),              # wcA
                pl.BlockSpec((Cout, 2 * HW, 2 * hidden),
                             lambda b: (0, 0, 0)),                        # w1f
                pl.BlockSpec((1, 2 * hidden), lambda b: (0, 0)),          # b1f
                pl.BlockSpec((2 * hidden, 2 * num_spec), lambda b: (0, 0)),  # w2f
            ],
            out_specs=pl.BlockSpec((1, 1, 2 * num_spec), lambda b: (b, 0, 0)),
        ),
        compiler_params=pltpu.CompilerParams(
            dimension_semantics=("parallel",),
            vmem_limit_bytes=32 * 1024 * 1024),
    )(colmur2, mradS, wcA, w1f, b1f, w2f)

    pooled = pooled[:, 0, :]                                 # [B, 2*num_spec]
    ub = pooled[:, :num_spec] + b2m
    lb = b2m - pooled[:, num_spec:]
    return ub, lb


def parallel_bound_pool_forward(x_U, x_L, eps, C, neighbor, pos_patch_width,
                                pos_patch_length, params):
    return interval_range_pool(x_U, x_L, eps, C, neighbor, pos_patch_width,
                               pos_patch_length, params)


# ----------------------------------------------------------------------------
# Pure-JAX (XLA) IBP reference, one patch position at a time.
# ----------------------------------------------------------------------------
def _reference_forward(x_U, x_L, eps, C, neighbor, pos_patch_width,
                       pos_patch_length, params):
    B, Cin, H, W = x_U.shape
    hp = jax.lax.Precision.HIGHEST
    Cout = params["w_conv"].shape[0]
    wflat = params["w_conv"].reshape(Cout, Cin * 9)
    ubs, lbs = [], []
    for (i, j) in _patch_positions(H, W, neighbor, pos_patch_width,
                                   pos_patch_length):
        m = jnp.zeros((H, W), jnp.float32).at[i:i + pos_patch_width,
                                              j:j + pos_patch_length].set(1.0)
        xu = x_U + eps * m
        xl = x_L - eps * m
        mu = (xu + xl) * 0.5
        r = (xu - xl) * 0.5
        c1 = (jnp.einsum('ok,bkh->boh', wflat, im2col_T(mu), precision=hp)
              + params["b_conv"][None, :, None])
        r1 = jnp.einsum('ok,bkh->boh', jnp.abs(wflat), im2col_T(r), precision=hp)
        ub1 = jax.nn.relu(c1 + r1).reshape(B, -1)   # (C, H, W) flatten
        lb1 = jax.nn.relu(c1 - r1).reshape(B, -1)
        mu2 = (ub1 + lb1) * 0.5
        r2 = (ub1 - lb1) * 0.5
        c2 = jnp.dot(mu2, params["w_fc1"].T, precision=hp) + params["b_fc1"]
        rr2 = jnp.dot(r2, jnp.abs(params["w_fc1"]).T, precision=hp)
        ub2 = jax.nn.relu(c2 + rr2)
        lb2 = jax.nn.relu(c2 - rr2)
        wm = jnp.dot(C, params["w_fc2"], precision=hp)
        bm = jnp.dot(C, params["b_fc2"], precision=hp)
        mu3 = (ub2 + lb2) * 0.5
        r3 = (ub2 - lb2) * 0.5
        c3 = jnp.dot(mu3, wm.T, precision=hp) + bm
        d3 = jnp.dot(r3, jnp.abs(wm).T, precision=hp)
        ubs.append(c3 + d3)
        lbs.append(c3 - d3)
    return jnp.max(jnp.stack(ubs), axis=0), jnp.min(jnp.stack(lbs), axis=0)


# ----------------------------------------------------------------------------
# Main
# ----------------------------------------------------------------------------
if __name__ == "__main__":
    key = jax.random.PRNGKey(0)
    kx, kw1, kb1, kw2, kb2, kw3, kb3 = jax.random.split(key, 7)

    B, Cin, H, W = 2, 4, 16, 16
    Cout, hidden, num_classes = 8, 32, 10

    params = {
        "w_conv": 0.1 * jax.random.normal(kw1, (Cout, Cin, 3, 3), jnp.float32),
        "b_conv": 0.1 * jax.random.normal(kb1, (Cout,), jnp.float32),
        "w_fc1":  0.05 * jax.random.normal(kw2, (hidden, Cout * H * W), jnp.float32),
        "b_fc1":  0.1 * jax.random.normal(kb2, (hidden,), jnp.float32),
        "w_fc2":  0.1 * jax.random.normal(kw3, (num_classes, hidden), jnp.float32),
        "b_fc2":  0.1 * jax.random.normal(kb3, (num_classes,), jnp.float32),
    }

    x = jax.random.uniform(kx, (B, Cin, H, W), jnp.float32)
    x_U = x + 0.01
    x_L = x - 0.01
    eps = 0.1

    # Specification matrix C: margins (class 0 vs each other class).
    num_spec = num_classes - 1
    C = jnp.zeros((num_spec, num_classes), jnp.float32).at[:, 0].set(1.0)
    C = C.at[jnp.arange(num_spec), jnp.arange(1, num_classes)].set(-1.0)

    fwd = jax.jit(parallel_bound_pool_forward,
                  static_argnames=("neighbor", "pos_patch_width",
                                   "pos_patch_length"))
    ub, lb = fwd(x_U, x_L, eps, C, neighbor=8, pos_patch_width=4,
                 pos_patch_length=4, params=params)
    ub, lb = jax.block_until_ready((ub, lb))

    assert ub.shape == (B, num_spec) and lb.shape == (B, num_spec)
    assert bool(jnp.all(ub >= lb - 1e-5)), "upper bound below lower bound"

    # Numerical check against a pure-JAX reference.
    ub_ref, lb_ref = _reference_forward(x_U, x_L, eps, C, 8, 4, 4, params)
    assert bool(jnp.allclose(ub, ub_ref, rtol=3e-2, atol=3e-2)), "ub mismatch"
    assert bool(jnp.allclose(lb, lb_ref, rtol=3e-2, atol=3e-2)), "lb mismatch"

    print("KERNEL_OK")
</pallas_src>

<mosaic_0001>
module attributes {stable_mosaic.version = 11 : i64} {
  func.func @_fused_ibp_pool_kernel(%arg0: i32, %arg1: memref<1x73x512xf32, #tpu.memory_space<vmem>>, %arg2: memref<8x4x512xf32, #tpu.memory_space<vmem>>, %arg3: memref<8x73xf32, #tpu.memory_space<vmem>>, %arg4: memref<8x512x64xf32, #tpu.memory_space<vmem>>, %arg5: memref<1x64xf32, #tpu.memory_space<vmem>>, %arg6: memref<64x18xf32, #tpu.memory_space<vmem>>, %arg7: memref<1x1x18xf32, #tpu.memory_space<vmem>>) attributes {dimension_semantics = [#tpu.dimension_semantics<parallel>], iteration_bounds = array<i64: 2>, scalar_prefetch = 0 : i64, scratch_operands = 0 : i64, tpu.core_type = #tpu.core_type<tc>, window_params = [{transform_indices = @transform_0, window_bounds = array<i64: 1, 73, 512>}, {pipeline_mode = #tpu.pipeline_mode<synchronous>, transform_indices = @transform_1, window_bounds = array<i64: 8, 4, 512>}, {pipeline_mode = #tpu.pipeline_mode<synchronous>, transform_indices = @transform_2, window_bounds = array<i64: 8, 73>}, {pipeline_mode = #tpu.pipeline_mode<synchronous>, transform_indices = @transform_3, window_bounds = array<i64: 8, 512, 64>}, {pipeline_mode = #tpu.pipeline_mode<synchronous>, transform_indices = @transform_4, window_bounds = array<i64: 1, 64>}, {pipeline_mode = #tpu.pipeline_mode<synchronous>, transform_indices = @transform_5, window_bounds = array<i64: 64, 18>}, {transform_indices = @transform_6, window_bounds = array<i64: 1, 1, 18>}]} {
    %c0 = arith.constant 0 : index
    %c0_0 = arith.constant 0 : index
    %0 = vector.load %arg3[%c0, %c0_0] : memref<8x73xf32, #tpu.memory_space<vmem>>, vector<8x73xf32>
    %c0_1 = arith.constant 0 : index
    %c0_2 = arith.constant 0 : index
    %c0_3 = arith.constant 0 : index
    %1 = vector.load %arg1[%c0_1, %c0_2, %c0_3] : memref<1x73x512xf32, #tpu.memory_space<vmem>>, vector<1x73x512xf32>
    %2 = vector.shape_cast %1 : vector<1x73x512xf32> to vector<73x512xf32>
    %cst = arith.constant dense<0.000000e+00> : vector<8x512xf32>
    %3 = tpu.matmul %0, %2, %cst {dimension_numbers = #tpu.dot_dimension_numbers<[1], [0], [0], [1], [0, 0, 1, 1], [], []>} : vector<8x73xf32>, vector<73x512xf32>, vector<8x512xf32> -> vector<8x512xf32>
    %4 = vector.extract_strided_slice %3 {offsets = [0, 0], sizes = [1, 512], strides = [1, 1]} : vector<8x512xf32> to vector<1x512xf32>
    %c0_4 = arith.constant 0 : index
    %c0_5 = arith.constant 0 : index
    %c0_6 = arith.constant 0 : index
    %5 = vector.load %arg2[%c0_4, %c0_5, %c0_6] : memref<8x4x512xf32, #tpu.memory_space<vmem>>, vector<1x4x512xf32>
    %6 = vector.shape_cast %5 : vector<1x4x512xf32> to vector<4x512xf32>
    %7 = vector.broadcast %4 : vector<1x512xf32> to vector<4x512xf32>
    %8 = arith.addf %7, %6 : vector<4x512xf32>
    %cst_7 = arith.constant 0.000000e+00 : f32
    %9 = vector.broadcast %cst_7 : f32 to vector<4x512xf32>
    %10 = arith.maximumf %8, %9 : vector<4x512xf32>
    %c0_8 = arith.constant 0 : index
    %c0_9 = arith.constant 0 : index
    %c0_10 = arith.constant 0 : index
    %11 = vector.load %arg4[%c0_8, %c0_9, %c0_10] : memref<8x512x64xf32, #tpu.memory_space<vmem>>, vector<1x512x64xf32>
    %12 = vector.shape_cast %11 : vector<1x512x64xf32> to vector<512x64xf32>
    %cst_11 = arith.constant dense<0.000000e+00> : vector<4x64xf32>
    %13 = tpu.matmul %10, %12, %cst_11 {dimension_numbers = #tpu.dot_dimension_numbers<[1], [0], [0], [1], [0, 0, 1, 1], [], []>} : vector<4x512xf32>, vector<512x64xf32>, vector<4x64xf32> -> vector<4x64xf32>
    %14 = vector.extract_strided_slice %3 {offsets = [1, 0], sizes = [1, 512], strides = [1, 1]} : vector<8x512xf32> to vector<1x512xf32>
    %c1 = arith.constant 1 : index
    %c0_12 = arith.constant 0 : index
    %c0_13 = arith.constant 0 : index
    %15 = vector.load %arg2[%c1, %c0_12, %c0_13] : memref<8x4x512xf32, #tpu.memory_space<vmem>>, vector<1x4x512xf32>
    %16 = vector.shape_cast %15 : vector<1x4x512xf32> to vector<4x512xf32>
    %17 = vector.broadcast %14 : vector<1x512xf32> to vector<4x512xf32>
    %18 = arith.addf %17, %16 : vector<4x512xf32>
    %cst_14 = arith.constant 0.000000e+00 : f32
    %19 = vector.broadcast %cst_14 : f32 to vector<4x512xf32>
    %20 = arith.maximumf %18, %19 : vector<4x512xf32>
    %c1_15 = arith.constant 1 : index
    %c0_16 = arith.constant 0 : index
    %c0_17 = arith.constant 0 : index
    %21 = vector.load %arg4[%c1_15, %c0_16, %c0_17] : memref<8x512x64xf32, #tpu.memory_space<vmem>>, vector<1x512x64xf32>
    %22 = vector.shape_cast %21 : vector<1x512x64xf32> to vector<512x64xf32>
    %cst_18 = arith.constant dense<0.000000e+00> : vector<4x64xf32>
    %23 = tpu.matmul %20, %22, %cst_18 {dimension_numbers = #tpu.dot_dimension_numbers<[1], [0], [0], [1], [0, 0, 1, 1], [], []>} : vector<4x512xf32>, vector<512x64xf32>, vector<4x64xf32> -> vector<4x64xf32>
    %24 = arith.addf %13, %23 : vector<4x64xf32>
    %25 = vector.extract_strided_slice %3 {offsets = [2, 0], sizes = [1, 512], strides = [1, 1]} : vector<8x512xf32> to vector<1x512xf32>
    %c2 = arith.constant 2 : index
    %c0_19 = arith.constant 0 : index
    %c0_20 = arith.constant 0 : index
    %26 = vector.load %arg2[%c2, %c0_19, %c0_20] : memref<8x4x512xf32, #tpu.memory_space<vmem>>, vector<1x4x512xf32>
    %27 = vector.shape_cast %26 : vector<1x4x512xf32> to vector<4x512xf32>
    %28 = vector.broadcast %25 : vector<1x512xf32> to vector<4x512xf32>
    %29 = arith.addf %28, %27 : vector<4x512xf32>
    %cst_21 = arith.constant 0.000000e+00 : f32
    %30 = vector.broadcast %cst_21 : f32 to vector<4x512xf32>
    %31 = arith.maximumf %29, %30 : vector<4x512xf32>
    %c2_22 = arith.constant 2 : index
    %c0_23 = arith.constant 0 : index
    %c0_24 = arith.constant 0 : index
    %32 = vector.load %arg4[%c2_22, %c0_23, %c0_24] : memref<8x512x64xf32, #tpu.memory_space<vmem>>, vector<1x512x64xf32>
    %33 = vector.shape_cast %32 : vector<1x512x64xf32> to vector<512x64xf32>
    %cst_25 = arith.constant dense<0.000000e+00> : vector<4x64xf32>
    %34 = tpu.matmul %31, %33, %cst_25 {dimension_numbers = #tpu.dot_dimension_numbers<[1], [0], [0], [1], [0, 0, 1, 1], [], []>} : vector<4x512xf32>, vector<512x64xf32>, vector<4x64xf32> -> vector<4x64xf32>
    %35 = arith.addf %24, %34 : vector<4x64xf32>
    %36 = vector.extract_strided_slice %3 {offsets = [3, 0], sizes = [1, 512], strides = [1, 1]} : vector<8x512xf32> to vector<1x512xf32>
    %c3 = arith.constant 3 : index
    %c0_26 = arith.constant 0 : index
    %c0_27 = arith.constant 0 : index
    %37 = vector.load %arg2[%c3, %c0_26, %c0_27] : memref<8x4x512xf32, #tpu.memory_space<vmem>>, vector<1x4x512xf32>
    %38 = vector.shape_cast %37 : vector<1x4x512xf32> to vector<4x512xf32>
    %39 = vector.broadcast %36 : vector<1x512xf32> to vector<4x512xf32>
    %40 = arith.addf %39, %38 : vector<4x512xf32>
    %cst_28 = arith.constant 0.000000e+00 : f32
    %41 = vector.broadcast %cst_28 : f32 to vector<4x512xf32>
    %42 = arith.maximumf %40, %41 : vector<4x512xf32>
    %c3_29 = arith.constant 3 : index
    %c0_30 = arith.constant 0 : index
    %c0_31 = arith.constant 0 : index
    %43 = vector.load %arg4[%c3_29, %c0_30, %c0_31] : memref<8x512x64xf32, #tpu.memory_space<vmem>>, vector<1x512x64xf32>
    %44 = vector.shape_cast %43 : vector<1x512x64xf32> to vector<512x64xf32>
    %cst_32 = arith.constant dense<0.000000e+00> : vector<4x64xf32>
    %45 = tpu.matmul %42, %44, %cst_32 {dimension_numbers = #tpu.dot_dimension_numbers<[1], [0], [0], [1], [0, 0, 1, 1], [], []>} : vector<4x512xf32>, vector<512x64xf32>, vector<4x64xf32> -> vector<4x64xf32>
    %46 = arith.addf %35, %45 : vector<4x64xf32>
    %47 = vector.extract_strided_slice %3 {offsets = [4, 0], sizes = [1, 512], strides = [1, 1]} : vector<8x512xf32> to vector<1x512xf32>
    %c4 = arith.constant 4 : index
    %c0_33 = arith.constant 0 : index
    %c0_34 = arith.constant 0 : index
    %48 = vector.load %arg2[%c4, %c0_33, %c0_34] : memref<8x4x512xf32, #tpu.memory_space<vmem>>, vector<1x4x512xf32>
    %49 = vector.shape_cast %48 : vector<1x4x512xf32> to vector<4x512xf32>
    %50 = vector.broadcast %47 : vector<1x512xf32> to vector<4x512xf32>
    %51 = arith.addf %50, %49 : vector<4x512xf32>
    %cst_35 = arith.constant 0.000000e+00 : f32
    %52 = vector.broadcast %cst_35 : f32 to vector<4x512xf32>
    %53 = arith.maximumf %51, %52 : vector<4x512xf32>
    %c4_36 = arith.constant 4 : index
    %c0_37 = arith.constant 0 : index
    %c0_38 = arith.constant 0 : index
    %54 = vector.load %arg4[%c4_36, %c0_37, %c0_38] : memref<8x512x64xf32, #tpu.memory_space<vmem>>, vector<1x512x64xf32>
    %55 = vector.shape_cast %54 : vector<1x512x64xf32> to vector<512x64xf32>
    %cst_39 = arith.constant dense<0.000000e+00> : vector<4x64xf32>
    %56 = tpu.matmul %53, %55, %cst_39 {dimension_numbers = #tpu.dot_dimension_numbers<[1], [0], [0], [1], [0, 0, 1, 1], [], []>} : vector<4x512xf32>, vector<512x64xf32>, vector<4x64xf32> -> vector<4x64xf32>
    %57 = arith.addf %46, %56 : vector<4x64xf32>
    %58 = vector.extract_strided_slice %3 {offsets = [5, 0], sizes = [1, 512], strides = [1, 1]} : vector<8x512xf32> to vector<1x512xf32>
    %c5 = arith.constant 5 : index
    %c0_40 = arith.constant 0 : index
    %c0_41 = arith.constant 0 : index
    %59 = vector.load %arg2[%c5, %c0_40, %c0_41] : memref<8x4x512xf32, #tpu.memory_space<vmem>>, vector<1x4x512xf32>
    %60 = vector.shape_cast %59 : vector<1x4x512xf32> to vector<4x512xf32>
    %61 = vector.broadcast %58 : vector<1x512xf32> to vector<4x512xf32>
    %62 = arith.addf %61, %60 : vector<4x512xf32>
    %cst_42 = arith.constant 0.000000e+00 : f32
    %63 = vector.broadcast %cst_42 : f32 to vector<4x512xf32>
    %64 = arith.maximumf %62, %63 : vector<4x512xf32>
    %c5_43 = arith.constant 5 : index
    %c0_44 = arith.constant 0 : index
    %c0_45 = arith.constant 0 : index
    %65 = vector.load %arg4[%c5_43, %c0_44, %c0_45] : memref<8x512x64xf32, #tpu.memory_space<vmem>>, vector<1x512x64xf32>
    %66 = vector.shape_cast %65 : vector<1x512x64xf32> to vector<512x64xf32>
    %cst_46 = arith.constant dense<0.000000e+00> : vector<4x64xf32>
    %67 = tpu.matmul %64, %66, %cst_46 {dimension_numbers = #tpu.dot_dimension_numbers<[1], [0], [0], [1], [0, 0, 1, 1], [], []>} : vector<4x512xf32>, vector<512x64xf32>, vector<4x64xf32> -> vector<4x64xf32>
    %68 = arith.addf %57, %67 : vector<4x64xf32>
    %69 = vector.extract_strided_slice %3 {offsets = [6, 0], sizes = [1, 512], strides = [1, 1]} : vector<8x512xf32> to vector<1x512xf32>
    %c6 = arith.constant 6 : index
    %c0_47 = arith.constant 0 : index
    %c0_48 = arith.constant 0 : index
    %70 = vector.load %arg2[%c6, %c0_47, %c0_48] : memref<8x4x512xf32, #tpu.memory_space<vmem>>, vector<1x4x512xf32>
    %71 = vector.shape_cast %70 : vector<1x4x512xf32> to vector<4x512xf32>
    %72 = vector.broadcast %69 : vector<1x512xf32> to vector<4x512xf32>
    %73 = arith.addf %72, %71 : vector<4x512xf32>
    %cst_49 = arith.constant 0.000000e+00 : f32
    %74 = vector.broadcast %cst_49 : f32 to vector<4x512xf32>
    %75 = arith.maximumf %73, %74 : vector<4x512xf32>
    %c6_50 = arith.constant 6 : index
    %c0_51 = arith.constant 0 : index
    %c0_52 = arith.constant 0 : index
    %76 = vector.load %arg4[%c6_50, %c0_51, %c0_52] : memref<8x512x64xf32, #tpu.memory_space<vmem>>, vector<1x512x64xf32>
    %77 = vector.shape_cast %76 : vector<1x512x64xf32> to vector<512x64xf32>
    %cst_53 = arith.constant dense<0.000000e+00> : vector<4x64xf32>
    %78 = tpu.matmul %75, %77, %cst_53 {dimension_numbers = #tpu.dot_dimension_numbers<[1], [0], [0], [1], [0, 0, 1, 1], [], []>} : vector<4x512xf32>, vector<512x64xf32>, vector<4x64xf32> -> vector<4x64xf32>
    %79 = arith.addf %68, %78 : vector<4x64xf32>
    %80 = vector.extract_strided_slice %3 {offsets = [7, 0], sizes = [1, 512], strides = [1, 1]} : vector<8x512xf32> to vector<1x512xf32>
    %c7 = arith.constant 7 : index
    %c0_54 = arith.constant 0 : index
    %c0_55 = arith.constant 0 : index
    %81 = vector.load %arg2[%c7, %c0_54, %c0_55] : memref<8x4x512xf32, #tpu.memory_space<vmem>>, vector<1x4x512xf32>
    %82 = vector.shape_cast %81 : vector<1x4x512xf32> to vector<4x512xf32>
    %83 = vector.broadcast %80 : vector<1x512xf32> to vector<4x512xf32>
    %84 = arith.addf %83, %82 : vector<4x512xf32>
    %cst_56 = arith.constant 0.000000e+00 : f32
    %85 = vector.broadcast %cst_56 : f32 to vector<4x512xf32>
    %86 = arith.maximumf %84, %85 : vector<4x512xf32>
    %c7_57 = arith.constant 7 : index
    %c0_58 = arith.constant 0 : index
    %c0_59 = arith.constant 0 : index
    %87 = vector.load %arg4[%c7_57, %c0_58, %c0_59] : memref<8x512x64xf32, #tpu.memory_space<vmem>>, vector<1x512x64xf32>
    %88 = vector.shape_cast %87 : vector<1x512x64xf32> to vector<512x64xf32>
    %cst_60 = arith.constant dense<0.000000e+00> : vector<4x64xf32>
    %89 = tpu.matmul %86, %88, %cst_60 {dimension_numbers = #tpu.dot_dimension_numbers<[1], [0], [0], [1], [0, 0, 1, 1], [], []>} : vector<4x512xf32>, vector<512x64xf32>, vector<4x64xf32> -> vector<4x64xf32>
    %90 = arith.addf %79, %89 : vector<4x64xf32>
    %c0_61 = arith.constant 0 : index
    %c0_62 = arith.constant 0 : index
    %91 = vector.load %arg5[%c0_61, %c0_62] : memref<1x64xf32, #tpu.memory_space<vmem>>, vector<1x64xf32>
    %92 = vector.broadcast %91 : vector<1x64xf32> to vector<4x64xf32>
    %93 = arith.addf %90, %92 : vector<4x64xf32>
    %cst_63 = arith.constant 0.000000e+00 : f32
    %94 = vector.broadcast %cst_63 : f32 to vector<4x64xf32>
    %95 = arith.maximumf %93, %94 : vector<4x64xf32>
    %c0_64 = arith.constant 0 : index
    %c0_65 = arith.constant 0 : index
    %96 = vector.load %arg6[%c0_64, %c0_65] : memref<64x18xf32, #tpu.memory_space<vmem>>, vector<64x18xf32>
    %cst_66 = arith.constant dense<0.000000e+00> : vector<4x18xf32>
    %97 = tpu.matmul %95, %96, %cst_66 {dimension_numbers = #tpu.dot_dimension_numbers<[1], [0], [0], [1], [0, 0, 1, 1], [], []>} : vector<4x64xf32>, vector<64x18xf32>, vector<4x18xf32> -> vector<4x18xf32>
    %cst_67 = arith.constant dense<0xFF800000> : vector<18xf32>
    %98 = vector.multi_reduction <maximumf>, %97, %cst_67 [0] : vector<4x18xf32> to vector<18xf32>
    %99 = vector.shape_cast %98 : vector<18xf32> to vector<1x18xf32>
    %c0_68 = arith.constant 0 : index
    %c0_69 = arith.constant 0 : index
    %c0_70 = arith.constant 0 : index
    %100 = vector.load %arg7[%c0_68, %c0_69, %c0_70] : memref<1x1x18xf32, #tpu.memory_space<vmem>>, vector<1x1x18xf32>
    %101 = vector.shape_cast %100 : vector<1x1x18xf32> to vector<1x18xf32>
    %102 = vector.shape_cast %99 : vector<1x18xf32> to vector<1x1x18xf32>
    tpu.vector_store %arg7[%c0_68, %c0_69, %c0_70], %102 {strides = array<i32>} : memref<1x1x18xf32, #tpu.memory_space<vmem>>, vector<1x1x18xf32>,
    return
  }
  func.func @transform_0(%arg0: i32) -> (i32, i32, i32) {
    %c0_i32 = arith.constant 0 : i32
    %c0_i32_0 = arith.constant 0 : i32
    %c0_i32_1 = arith.constant 0 : i32
    return %arg0, %c0_i32, %c0_i32_0 : i32, i32, i32
  }
  func.func @transform_1(%arg0: i32) -> (i32, i32, i32) {
    %c0_i32 = arith.constant 0 : i32
    %c0_i32_0 = arith.constant 0 : i32
    %c0_i32_1 = arith.constant 0 : i32
    %c0_i32_2 = arith.constant 0 : i32
    return %c0_i32, %c0_i32_0, %c0_i32_1 : i32, i32, i32
  }
  func.func @transform_2(%arg0: i32) -> (i32, i32) {
    %c0_i32 = arith.constant 0 : i32
    %c0_i32_0 = arith.constant 0 : i32
    %c0_i32_1 = arith.constant 0 : i32
    return %c0_i32, %c0_i32_0 : i32, i32
  }
  func.func @transform_3(%arg0: i32) -> (i32, i32, i32) {
    %c0_i32 = arith.constant 0 : i32
    %c0_i32_0 = arith.constant 0 : i32
    %c0_i32_1 = arith.constant 0 : i32
    %c0_i32_2 = arith.constant 0 : i32
    return %c0_i32, %c0_i32_0, %c0_i32_1 : i32, i32, i32
  }
  func.func @transform_4(%arg0: i32) -> (i32, i32) {
    %c0_i32 = arith.constant 0 : i32
    %c0_i32_0 = arith.constant 0 : i32
    %c0_i32_1 = arith.constant 0 : i32
    return %c0_i32, %c0_i32_0 : i32, i32
  }
  func.func @transform_5(%arg0: i32) -> (i32, i32) {
    %c0_i32 = arith.constant 0 : i32
    %c0_i32_0 = arith.constant 0 : i32
    %c0_i32_1 = arith.constant 0 : i32
    return %c0_i32, %c0_i32_0 : i32, i32
  }
  func.func @transform_6(%arg0: i32) -> (i32, i32, i32) {
    %c0_i32 = arith.constant 0 : i32
    %c0_i32_0 = arith.constant 0 : i32
    %c0_i32_1 = arith.constant 0 : i32
    return %arg0, %c0_i32, %c0_i32_0 : i32, i32, i32
  }
}

</mosaic_0001>

<bundles_post_ra>
// kernel: neg.4
= control target key start
LH: loop header
LB: loop body
LE: loop exit
PB: predicated region body
PF: predicated region fallthrough
CT: control target
= control target key end

     0   :  { %s328_s0 = inlined_call_operand.vmem [shape: f32[2,36,256], index: 0, kind: input, shape index: {}]   ;;  %s329_s1 = inlined_call_operand.vmem [shape: f32[2,36,256], index: 1, kind: output, shape index: {}]  }
   0x1   :  { %v2_v0 = vld [vmem:[%s328_s0] sm:$0xff]  ;;  %v160_v1 = vld [vmem:[%s328_s0 + $0x50] sm:$0xff]  ;;  %v178_v19 = vld [vmem:[%s328_s0 + $0x8] sm:$0xff] }
   0x2   :  { %v162_v2 = vld [vmem:[%s328_s0 + $0x10] sm:$0xff]  ;;  %v5_v3 = vxor.u32 2147483648, %v2_v0  ;;  %v12_v4 = vxor.u32 2147483648, %v160_v1  ;;  %v164_v6 = vld [vmem:[%s328_s0 + $0x60] sm:$0xff]  ;;  %v180_v20 = vld [vmem:[%s328_s0 + $0x58] sm:$0xff]  ;;  %v84_v22 = vxor.u32 2147483648, %v178_v19 }
   0x3   :  { %v20_v5 = vxor.u32 2147483648, %v162_v2  ;;  %v166_v7 = vld [vmem:[%s328_s0 + $0x20] sm:$0xff]  ;;  %v168_v8 = vld [vmem:[%s328_s0 + $0x70] sm:$0xff]  ;;  %v28_v9 = vxor.u32 2147483648, %v164_v6  ;;  %v92_v23 = vxor.u32 2147483648, %v180_v20  ;;  %v182_v24 = vld [vmem:[%s328_s0 + $0x18] sm:$0xff] }
   0x4   :  { %v36_v10 = vxor.u32 2147483648, %v166_v7  ;;  %v44_v11 = vxor.u32 2147483648, %v168_v8  ;;  %v170_v12 = vld [vmem:[%s328_s0 + $0x30] sm:$0xff]  ;;  %v172_v13 = vld [vmem:[%s328_s0 + $0x80] sm:$0xff]  ;;  %7 = vst [vmem:[%s329_s1] sm:$0xff] %v5_v3  ;;  %161 = vst [vmem:[%s329_s1 + $0x50] sm:$0xff] %v12_v4  ;;  %v100_v27 = vxor.u32 2147483648, %v182_v24 }
   0x5   :  { %v174_v14 = vld [vmem:[%s328_s0 + $0x40] sm:$0xff]  ;;  %163 = vst [vmem:[%s329_s1 + $0x10] sm:$0xff] %v20_v5  ;;  %v52_v15 = vxor.u32 2147483648, %v170_v12  ;;  %v60_v16 = vxor.u32 2147483648, %v172_v13  ;;  %v176_v18 = vld [vmem:[%s328_s0 + $0x90] sm:$0xff]  ;;  %165 = vst [vmem:[%s329_s1 + $0x60] sm:$0xff] %v28_v9 }
   0x6   :  { %v68_v17 = vxor.u32 2147483648, %v174_v14  ;;  %167 = vst [vmem:[%s329_s1 + $0x20] sm:$0xff] %v36_v10  ;;  %169 = vst [vmem:[%s329_s1 + $0x70] sm:$0xff] %v44_v11  ;;  %v76_v21 = vxor.u32 2147483648, %v176_v18  ;;  %v184_v25 = vld [vmem:[%s328_s0 + $0x68] sm:$0xff]  ;;  %v188_v30 = vld [vmem:[%s328_s0 + $0x78] sm:$0xff] }
   0x7   :  { %v186_v26 = vld [vmem:[%s328_s0 + $0x28] sm:$0xff]  ;;  %171 = vst [vmem:[%s329_s1 + $0x30] sm:$0xff] %v52_v15  ;;  %173 = vst [vmem:[%s329_s1 + $0x80] sm:$0xff] %v60_v16  ;;  %v108_v28 = vxor.u32 2147483648, %v184_v25  ;;  %v190_v31 = vld [vmem:[%s328_s0 + $0x38] sm:$0xff]  ;;  %v124_v33 = vxor.u32 2147483648, %v188_v30 }
   0x8   :  { %175 = vst [vmem:[%s329_s1 + $0x40] sm:$0xff] %v68_v17  ;;  %v116_v29 = vxor.u32 2147483648, %v186_v26  ;;  %v192_v32 = vld [vmem:[%s328_s0 + $0x88] sm:$0xff]  ;;  %177 = vst [vmem:[%s329_s1 + $0x90] sm:$0xff] %v76_v21  ;;  %v132_v34 = vxor.u32 2147483648, %v190_v31  ;;  %v196_v37 = vld [vmem:[%s328_s0 + $0x98] sm:$0xff] }
   0x9   :  { %179 = vst [vmem:[%s329_s1 + $0x8] sm:$0xff] %v84_v22  ;;  %181 = vst [vmem:[%s329_s1 + $0x58] sm:$0xff] %v92_v23  ;;  %v140_v35 = vxor.u32 2147483648, %v192_v32  ;;  %v194_v36 = vld [vmem:[%s328_s0 + $0x48] sm:$0xff]  ;;  %v156_v39 = vxor.u32 2147483648, %v196_v37 }
   0xa   :  { %183 = vst [vmem:[%s329_s1 + $0x18] sm:$0xff] %v100_v27  ;;  %185 = vst [vmem:[%s329_s1 + $0x68] sm:$0xff] %v108_v28  ;;  %v148_v38 = vxor.u32 2147483648, %v194_v36 }
   0xb   :  { %187 = vst [vmem:[%s329_s1 + $0x28] sm:$0xff] %v116_v29  ;;  %189 = vst [vmem:[%s329_s1 + $0x78] sm:$0xff] %v124_v33 }
   0xc   :  { %191 = vst [vmem:[%s329_s1 + $0x38] sm:$0xff] %v132_v34  ;;  %193 = vst [vmem:[%s329_s1 + $0x88] sm:$0xff] %v140_v35 }
   0xd   :  { %195 = vst [vmem:[%s329_s1 + $0x48] sm:$0xff] %v148_v38  ;;  %197 = vst [vmem:[%s329_s1 + $0x98] sm:$0xff] %v156_v39 }

// kernel: parallel_bound_pool_forward.1
= control target key start
LH: loop header
LB: loop body
LE: loop exit
PB: predicated region body
PF: predicated region fallthrough
CT: control target
= control target key end

     0   :  { %s4214_s21 = smov 0   ;;  %s6130_s0 = inlined_call_operand.vmem [shape: f32[2,73,512], index: 0, kind: input, shape index: {}]   ;;  %s6131_s1 = inlined_call_operand.vmem [shape: f32[8,4,512], index: 1, kind: input, shape index: {}]   ;;  %s6132_s2 = inlined_call_operand.vmem [shape: f32[8,73], index: 2, kind: input, shape index: {}]   ;;  %s6133_s3 = inlined_call_operand.vmem [shape: f32[8,512,64], index: 3, kind: input, shape index: {}]   ;;  %s6134_s4 = inlined_call_operand.vmem [shape: f32[1,64], index: 4, kind: input, shape index: {}]   ;;  %s6135_s5 = inlined_call_operand.vmem [shape: f32[64,18], index: 5, kind: input, shape index: {}]   ;;  %s6136_s6 = inlined_call_operand.vmem [shape: f32[2,1,18], index: 6, kind: output, shape index: {}]  }
   0x1 LB: > { %s2504_s22 = sadd.s32 4294967295, %s4173_s21   ;;  %p2508_p0 = scmp.ge.s32.totalorder %s4173_s21, 1  ;;  %s4173_s21 = sphi %s4214_s21, %s16_s21  }
   0x2   : > { %p212_p1 = scmp.lt.s32.totalorder %s4173_s21, 3 }
   0x4   : > { %p213_p2 = pnand %p2508_p0, %p212_p1 }
   0x5   : > { %p240_p3 = scmp.lt.s32.totalorder (!%p213_p2), %s2504_s22, 1  ;;  %v4175_v0 = vmov (!%p213_p2), 0.0   ;;  %vm293_vm0 = vcmask (!%p213_p2), 1040384   ;;  %vm4176_vm1 = vmmov (!%p213_p2), 1   ;;  %v2534_v57 = vld [vmem:[%s6133_s3 + $0x280] sm:$0xff] (!%p213_p2)  ;;  %v2535_v61 = vld [vmem:[%s6133_s3 + $0x288] sm:$0xff] (!%p213_p2) }
   0x6   : > { %216 = sbr.rel (%p213_p2) target bundleno = 935 (0x3a7), region = 44  ;;  %370 = vmatprep.mubr.f32.mxu0 (!%p213_p2), %v4175_v0  ;;  %441 = vmatprep.mubr.f32.mxu1 (!%p213_p2), %v4175_v0  ;;  %vm4268_vm2 = vmpackc.low (!%p213_p2), %vm293_vm0, %vm4176_vm1  ;;  %v2566_v62 = vld [vmem:[%s6133_s3 + $0x380] sm:$0xff] (!%p213_p2)  ;;  %v2567_v63 = vld [vmem:[%s6133_s3 + $0x388] sm:$0xff] (!%p213_p2)  ;;  %vm289_vm3 = vcmask (!%p213_p2), 596992   ;;  %vm4178_vm4 = vmmov (!%p213_p2), 0   ;;  %vm2373_vm5 = vcmask (!%p213_p2), 523264  }
   0x7   : > { %vm2447_vm6 = vcmask (!%p213_p2), 142336   ;;  %vm2455_vm7 = vcmask (!%p213_p2), 139264  }
   0xd   : > { %s6140_s22 = smov (!%p240_p3, %s2504_s22), 1 }
   0xe   : > { %s4138_s23 = smul.u32 320, %s6140_s22  ;;  %s247_s27 = scalar_lea.vmem %s6136_s6, %s6140_s22 }
  0x10   : > { %s4230_s26 = scalar_lea.vmem %s6130_s0, %s4138_s23 }
  0x11   : > { %v250_v1 = vld [vmem:[%s4230_s26 + $0x8] sm:$0xff]  ;;  %v252_v3 = vld [vmem:[%s4230_s26 + $0x18] sm:$0xff]  ;;  %v249_v6 = vld [vmem:[%s4230_s26] sm:$0xff] }
  0x12   : > { %v254_v2 = vld [vmem:[%s4230_s26 + $0x28] sm:$0xff]  ;;  %v256_v5 = vld [vmem:[%s4230_s26 + $0x38] sm:$0xff]  ;;  %v253_v7 = vld [vmem:[%s4230_s26 + $0x20] sm:$0xff] }
  0x13   : > { %v3570_v4 = vpack.c.bf16 %v254_v2, %v250_v1  ;;  %v3592_v8 = vpack.c.bf16 %v256_v5, %v252_v3  ;;  %v3572_v9 = vpack.c.bf16 %v253_v7, %v249_v6  ;;  %v251_v10 = vld [vmem:[%s4230_s26 + $0x10] sm:$0xff]  ;;  %v258_v12 = vld [vmem:[%s4230_s26 + $0x48] sm:$0xff]  ;;  %v260_v15 = vld [vmem:[%s4230_s26 + $0x58] sm:$0xff]  ;;  %v3614_v3 = vpack.c.bf16 %v2535_v61, %v2534_v57 }
  0x14   : > { %v255_v11 = vld [vmem:[%s4230_s26 + $0x30] sm:$0xff]  ;;  %v262_v14 = vld [vmem:[%s4230_s26 + $0x68] sm:$0xff]  ;;  %v264_v16 = vld [vmem:[%s4230_s26 + $0x78] sm:$0xff]  ;;  %v3646_v7 = vpack.c.bf16 %v2567_v63, %v2566_v62 }
  0x15   : > { %3571 = vmatprep.subr.bf16.mxu0 %v3570_v4  ;;  %v3594_v13 = vpack.c.bf16 %v255_v11, %v251_v10  ;;  %3593 = vmatprep.subr.bf16.mxu1 %v3592_v8  ;;  %v3574_v17 = vpack.c.bf16 %v262_v14, %v258_v12  ;;  %v3596_v18 = vpack.c.bf16 %v264_v16, %v260_v15  ;;  %v257_v19 = vld [vmem:[%s4230_s26 + $0x40] sm:$0xff]  ;;  %v259_v21 = vld [vmem:[%s4230_s26 + $0x50] sm:$0xff]  ;;  %v266_v24 = vld [vmem:[%s4230_s26 + $0x88] sm:$0xff] }
  0x16   : > { %3573 = vmatpush1.bf16.msra.mxu0 %v3572_v9  ;;  %v261_v20 = vld [vmem:[%s4230_s26 + $0x60] sm:$0xff]  ;;  %v263_v23 = vld [vmem:[%s4230_s26 + $0x70] sm:$0xff]  ;;  %v270_v25 = vld [vmem:[%s4230_s26 + $0xa8] sm:$0xff] }
  0x17   : > { %3595 = vmatpush1.bf16.msra.mxu1 %v3594_v13  ;;  %v3576_v22 = vpack.c.bf16 %v261_v20, %v257_v19  ;;  %3575 = vmatprep.subr.bf16.mxu0 %v3574_v17  ;;  %v3598_v26 = vpack.c.bf16 %v263_v23, %v259_v21  ;;  %v3578_v27 = vpack.c.bf16 %v270_v25, %v266_v24  ;;  %v268_v28 = vld [vmem:[%s4230_s26 + $0x98] sm:$0xff]  ;;  %v265_v30 = vld [vmem:[%s4230_s26 + $0x80] sm:$0xff]  ;;  %v267_v33 = vld [vmem:[%s4230_s26 + $0x90] sm:$0xff] }
  0x18   : > { %3597 = vmatprep.subr.bf16.mxu1 %v3596_v18  ;;  %v272_v29 = vld [vmem:[%s4230_s26 + $0xb8] sm:$0xff]  ;;  %v269_v32 = vld [vmem:[%s4230_s26 + $0xa0] sm:$0xff]  ;;  %v271_v34 = vld [vmem:[%s4230_s26 + $0xb0] sm:$0xff] }
  0x19   : > { %v3600_v31 = vpack.c.bf16 %v272_v29, %v268_v28  ;;  %v3580_v35 = vpack.c.bf16 %v269_v32, %v265_v30  ;;  %v274_v36 = vld [vmem:[%s4230_s26 + $0xc8] sm:$0xff]  ;;  %v276_v38 = vld [vmem:[%s4230_s26 + $0xd8] sm:$0xff]  ;;  %v3602_v39 = vpack.c.bf16 %v271_v34, %v267_v33  ;;  %v273_v42 = vld [vmem:[%s4230_s26 + $0xc0] sm:$0xff] }
  0x1a   : > { %3577 = vmatpush1.bf16.msra.mxu0 %v3576_v22  ;;  %v278_v37 = vld [vmem:[%s4230_s26 + $0xe8] sm:$0xff]  ;;  %v280_v41 = vld [vmem:[%s4230_s26 + $0xf8] sm:$0xff]  ;;  %v277_v43 = vld [vmem:[%s4230_s26 + $0xe0] sm:$0xff] }
  0x1b   : > { %3599 = vmatpush1.bf16.msra.mxu1 %v3598_v26  ;;  %3579 = vmatprep.subr.bf16.mxu0 %v3578_v27  ;;  %v3582_v40 = vpack.c.bf16 %v278_v37, %v274_v36  ;;  %v3604_v44 = vpack.c.bf16 %v280_v41, %v276_v38  ;;  %v275_v45 = vld [vmem:[%s4230_s26 + $0xd0] sm:$0xff]  ;;  %v282_v47 = vld [vmem:[%s4230_s26 + $0x108] sm:$0xff]  ;;  %v284_v49 = vld [vmem:[%s4230_s26 + $0x118] sm:$0xff]  ;;  %v3584_v51 = vpack.c.bf16 %v277_v43, %v273_v42 }
  0x1c   : > { %3601 = vmatprep.subr.bf16.mxu1 %v3600_v31  ;;  %v279_v46 = vld [vmem:[%s4230_s26 + $0xf0] sm:$0xff]  ;;  %v286_v48 = vld [vmem:[%s4230_s26 + $0x128] sm:$0x1]  ;;  %v288_v50 = vld [vmem:[%s4230_s26 + $0x138] sm:$0x1] }
  0x1d   : > { %v3606_v53 = vpack.c.bf16 %v279_v46, %v275_v45  ;;  %v3586_v54 = vpack.c.bf16 %v286_v48, %v282_v47  ;;  %v281_v55 = vld [vmem:[%s4230_s26 + $0x100] sm:$0xff]  ;;  %v3608_v58 = vpack.c.bf16 %v288_v50, %v284_v49  ;;  %v283_v59 = vld [vmem:[%s4230_s26 + $0x110] sm:$0xff]  ;;  %v2519_v5 = vld [vmem:[%s6133_s3 + $0x208] sm:$0xff] }
  0x1e   : > { %3581 = vmatpush1.bf16.msra.mxu0 %v3580_v35  ;;  %v285_v56 = vld [vmem:[%s4230_s26 + $0x120] sm:$0x1]  ;;  %v287_v60 = vld [vmem:[%s4230_s26 + $0x130] sm:$0x1]  ;;  %v2551_v8 = vld [vmem:[%s6133_s3 + $0x308] sm:$0xff] }
  0x1f   : > { %3603 = vmatpush1.bf16.msra.mxu1 %v3602_v39  ;;  %3583 = vmatprep.subr.bf16.mxu0 %v3582_v40  ;;  %v3589_v1 = vpack.c.bf16 %v285_v56, %v281_v55  ;;  %v3611_v2 = vpack.c.bf16 %v287_v60, %v283_v59  ;;  %v2518_v4 = vld [vmem:[%s6133_s3 + $0x200] sm:$0xff]  ;;  %v2536_v9 = vld [vmem:[%s6133_s3 + $0x290] sm:$0xff]  ;;  %v2537_v10 = vld [vmem:[%s6133_s3 + $0x298] sm:$0xff] }
  0x20   : > { %3605 = vmatprep.subr.bf16.mxu1 %v3604_v44  ;;  %v2550_v6 = vld [vmem:[%s6133_s3 + $0x300] sm:$0xff]  ;;  %v2568_v11 = vld [vmem:[%s6133_s3 + $0x390] sm:$0xff]  ;;  %v2569_v12 = vld [vmem:[%s6133_s3 + $0x398] sm:$0xff]  ;;  %v3616_v14 = vpack.c.bf16 %v2519_v5, %v2518_v4  ;;  %v3618_v16 = vpack.c.bf16 %v2537_v10, %v2536_v9 }
  0x21   : > { %v248_v13 = vld [vmem:[%s6132_s2] sm:$0xff]  ;;  %v3648_v15 = vpack.c.bf16 %v2551_v8, %v2550_v6  ;;  %v2520_v17 = vld [vmem:[%s6133_s3 + $0x210] sm:$0xff]  ;;  %v2521_v18 = vld [vmem:[%s6133_s3 + $0x218] sm:$0xff]  ;;  %v3650_v20 = vpack.c.bf16 %v2569_v12, %v2568_v11 }
  0x22   : > { %3585 = vmatpush1.bf16.msra.mxu0 %v3584_v51  ;;  %v2552_v19 = vld [vmem:[%s6133_s3 + $0x310] sm:$0xff]  ;;  %v2553_v21 = vld [vmem:[%s6133_s3 + $0x318] sm:$0xff]  ;;  %v2538_v22 = vld [vmem:[%s6133_s3 + $0x2a0] sm:$0xff]  ;;  %v3620_v26 = vpack.c.bf16 %v2521_v18, %v2520_v17 }
  0x23   : > { %3607 = vmatpush1.bf16.msra.mxu1 %v3606_v53  ;;  %3588 = vmatprep.subr.msk.bf16.mxu0 %vm4268_vm2, %v3586_v54  ;;  %v2539_v23 = vld [vmem:[%s6133_s3 + $0x2a8] sm:$0xff]  ;;  %v2570_v24 = vld [vmem:[%s6133_s3 + $0x3a0] sm:$0xff]  ;;  %v3652_v27 = vpack.c.bf16 %v2553_v21, %v2552_v19  ;;  %v2540_v34 = vld [vmem:[%s6133_s3 + $0x2b0] sm:$0xff] }
  0x24   : > { %3610 = vmatprep.subr.msk.bf16.mxu1 %vm4268_vm2, %v3608_v58  ;;  %v2571_v25 = vld [vmem:[%s6133_s3 + $0x3a8] sm:$0xff]  ;;  %v3622_v28 = vpack.c.bf16 %v2539_v23, %v2538_v22  ;;  %v2522_v29 = vld [vmem:[%s6133_s3 + $0x220] sm:$0xff]  ;;  %v2541_v35 = vld [vmem:[%s6133_s3 + $0x2b8] sm:$0xff] }
  0x25   : > { %v2523_v30 = vld [vmem:[%s6133_s3 + $0x228] sm:$0xff]  ;;  %v2554_v31 = vld [vmem:[%s6133_s3 + $0x320] sm:$0xff]  ;;  %v3654_v32 = vpack.c.bf16 %v2571_v25, %v2570_v24  ;;  %v2572_v36 = vld [vmem:[%s6133_s3 + $0x3b0] sm:$0xff]  ;;  %v3626_v40 = vpack.c.bf16 %v2541_v35, %v2540_v34 }
  0x26   : > { %3591 = vmatpush1.bf16.msk.msra.mxu0 %vm4268_vm2, %v3589_v1  ;;  %v2555_v33 = vld [vmem:[%s6133_s3 + $0x328] sm:$0xff]  ;;  %v2573_v37 = vld [vmem:[%s6133_s3 + $0x3b8] sm:$0xff]  ;;  %v3624_v38 = vpack.c.bf16 %v2523_v30, %v2522_v29  ;;  %v2524_v41 = vld [vmem:[%s6133_s3 + $0x230] sm:$0xff] }
  0x27   : > { %3613 = vmatpush1.bf16.msk.msra.mxu1 %vm4268_vm2, %v3611_v2  ;;  %3615 = vmatprep.subr.bf16.mxu0 %v3614_v3  ;;  %v3656_v39 = vpack.c.bf16 %v2555_v33, %v2554_v31  ;;  %v2525_v42 = vld [vmem:[%s6133_s3 + $0x238] sm:$0xff]  ;;  %v2556_v43 = vld [vmem:[%s6133_s3 + $0x330] sm:$0xff]  ;;  %v3658_v44 = vpack.c.bf16 %v2573_v37, %v2572_v36  ;;  %v2542_v46 = vld [vmem:[%s6133_s3 + $0x2c0] sm:$0xff] }
  0x28   : > { %3647 = vmatprep.subr.bf16.mxu1 %v3646_v7  ;;  %v2557_v45 = vld [vmem:[%s6133_s3 + $0x338] sm:$0xff]  ;;  %v2543_v47 = vld [vmem:[%s6133_s3 + $0x2c8] sm:$0xff]  ;;  %v2574_v48 = vld [vmem:[%s6133_s3 + $0x3c0] sm:$0xff]  ;;  %v3628_v50 = vpack.c.bf16 %v2525_v42, %v2524_v41 }
  0x29   : > { %2512 = vmatmul.mubr.msk.f32.vlgmr.msra.gmra.mrb[0].mxu0 %vm289_vm3, %v248_v13  ;;  %v2575_v49 = vld [vmem:[%s6133_s3 + $0x3c8] sm:$0xff]  ;;  %v3660_v51 = vpack.c.bf16 %v2557_v45, %v2556_v43  ;;  %v3630_v52 = vpack.c.bf16 %v2543_v47, %v2542_v46  ;;  %v2526_v53 = vld [vmem:[%s6133_s3 + $0x240] sm:$0xff]  ;;  %v2544_v58 = vld [vmem:[%s6133_s3 + $0x2d0] sm:$0xff] }
  0x2a   : > { %2515 = vmatmul.mubr.msk.f32.vlgmr.msra.gmra.mrb[0].mxu1 %vm289_vm3, %v248_v13  ;;  %3617 = vmatpush3.bf16.msra.mxu0 %v3616_v14  ;;  %v2527_v54 = vld [vmem:[%s6133_s3 + $0x248] sm:$0xff]  ;;  %v2558_v55 = vld [vmem:[%s6133_s3 + $0x340] sm:$0xff]  ;;  %v3662_v56 = vpack.c.bf16 %v2575_v49, %v2574_v48  ;;  %v2545_v59 = vld [vmem:[%s6133_s3 + $0x2d8] sm:$0xff] }
  0x2b   : > { %3649 = vmatpush3.bf16.msra.mxu1 %v3648_v15  ;;  %3619 = vmatprep.subr.bf16.mxu0 %v3618_v16  ;;  %v2559_v57 = vld [vmem:[%s6133_s3 + $0x348] sm:$0xff]  ;;  %v2576_v60 = vld [vmem:[%s6133_s3 + $0x3d0] sm:$0xff]  ;;  %v2577_v61 = vld [vmem:[%s6133_s3 + $0x3d8] sm:$0xff]  ;;  %v3632_v62 = vpack.c.bf16 %v2527_v54, %v2526_v53  ;;  %v3634_v1 = vpack.c.bf16 %v2545_v59, %v2544_v58 }
  0x2c   : > { %3651 = vmatprep.subr.bf16.mxu1 %v3650_v20  ;;  %v3664_v63 = vpack.c.bf16 %v2559_v57, %v2558_v55  ;;  %v2528_v2 = vld [vmem:[%s6133_s3 + $0x250] sm:$0xff]  ;;  %v2529_v3 = vld [vmem:[%s6133_s3 + $0x258] sm:$0xff]  ;;  %v3666_v4 = vpack.c.bf16 %v2577_v61, %v2576_v60  ;;  %v2546_v9 = vld [vmem:[%s6133_s3 + $0x2e0] sm:$0xff] }
  0x2d   : > { %v2560_v5 = vld [vmem:[%s6133_s3 + $0x350] sm:$0xff]  ;;  %v2561_v6 = vld [vmem:[%s6133_s3 + $0x358] sm:$0xff]  ;;  %v3636_v7 = vpack.c.bf16 %v2529_v3, %v2528_v2  ;;  %v2547_v10 = vld [vmem:[%s6133_s3 + $0x2e8] sm:$0xff] }
  0x2e   : > { %3621 = vmatpush3.bf16.msra.mxu0 %v3620_v26  ;;  %v3668_v8 = vpack.c.bf16 %v2561_v6, %v2560_v5  ;;  %v2578_v11 = vld [vmem:[%s6133_s3 + $0x3e0] sm:$0xff]  ;;  %v3638_v12 = vpack.c.bf16 %v2547_v10, %v2546_v9  ;;  %v2579_v13 = vld [vmem:[%s6133_s3 + $0x3e8] sm:$0xff]  ;;  %v2548_v21 = vld [vmem:[%s6133_s3 + $0x2f0] sm:$0xff] }
  0x2f   : > { %3653 = vmatpush3.bf16.msra.mxu1 %v3652_v27  ;;  %3623 = vmatprep.subr.bf16.mxu0 %v3622_v28  ;;  %v2530_v14 = vld [vmem:[%s6133_s3 + $0x260] sm:$0xff]  ;;  %v2531_v15 = vld [vmem:[%s6133_s3 + $0x268] sm:$0xff]  ;;  %v3670_v16 = vpack.c.bf16 %v2579_v13, %v2578_v11  ;;  %v2549_v22 = vld [vmem:[%s6133_s3 + $0x2f8] sm:$0xff] }
  0x30   : > { %3655 = vmatprep.subr.bf16.mxu1 %v3654_v32  ;;  %v3640_v17 = vpack.c.bf16 %v2531_v15, %v2530_v14  ;;  %v2562_v18 = vld [vmem:[%s6133_s3 + $0x360] sm:$0xff]  ;;  %v2563_v19 = vld [vmem:[%s6133_s3 + $0x368] sm:$0xff]  ;;  %v2580_v23 = vld [vmem:[%s6133_s3 + $0x3f0] sm:$0xff]  ;;  %v3642_v24 = vpack.c.bf16 %v2549_v22, %v2548_v21 }
  0x31   : > { %v3672_v20 = vpack.c.bf16 %v2563_v19, %v2562_v18  ;;  %v2581_v25 = vld [vmem:[%s6133_s3 + $0x3f8] sm:$0xff]  ;;  %v2532_v26 = vld [vmem:[%s6133_s3 + $0x270] sm:$0xff]  ;;  %v496_v33 = vld [vmem:[%s6133_s3 + $0x80] sm:$0xff] }
  0x32   : > { %3625 = vmatpush3.bf16.msra.mxu0 %v3624_v38  ;;  %v2533_v27 = vld [vmem:[%s6133_s3 + $0x278] sm:$0xff]  ;;  %v3674_v28 = vpack.c.bf16 %v2581_v25, %v2580_v23  ;;  %v2564_v30 = vld [vmem:[%s6133_s3 + $0x370] sm:$0xff]  ;;  %v497_v34 = vld [vmem:[%s6133_s3 + $0x88] sm:$0xff] }
  0x33   : > { %3657 = vmatpush3.bf16.msra.mxu1 %v3656_v39  ;;  %3627 = vmatprep.subr.bf16.mxu0 %v3626_v40  ;;  %v3644_v29 = vpack.c.bf16 %v2533_v27, %v2532_v26  ;;  %v2565_v31 = vld [vmem:[%s6133_s3 + $0x378] sm:$0xff]  ;;  %v528_v35 = vld [vmem:[%s6133_s3 + $0x180] sm:$0xff]  ;;  %v3678_v36 = vpack.c.bf16 %v497_v34, %v496_v33  ;;  %v529_v37 = vld [vmem:[%s6133_s3 + $0x188] sm:$0xff]  ;;  %v450_v39 = vlaneseq }
  0x34   : > { %3659 = vmatprep.subr.bf16.mxu1 %v3658_v44  ;;  %v3676_v32 = vpack.c.bf16 %v2565_v31, %v2564_v30  ;;  %v3710_v38 = vpack.c.bf16 %v529_v37, %v528_v35  ;;  %v2516_v41 = vld [vmem:[%s6131_s1 + $0x10] sm:$0xff]  ;;  %v2517_v44 = vld [vmem:[%s6131_s1 + $0x18] sm:$0xff]  ;;  %v4508_v45 = vld [vmem:[%s6131_s1] sm:$0xff] }
  0x35   : > { %v4493_v40 = vshrl.u32 %v450_v39, 7  ;;  %v4516_v47 = vld [vmem:[%s6131_s1 + $0x8] sm:$0xff]  ;;  %v565_v49 = vcombine.high %v2516_v41, %v2516_v41  ;;  %v468_v54 = vcombine.high %v4508_v45, %v4508_v45  ;;  %v512_v5 = vld [vmem:[%s6133_s3 + $0x100] sm:$0xff]  ;;  %v498_v9 = vld [vmem:[%s6133_s3 + $0x90] sm:$0xff] }
  0x36   : > { %3629 = vmatpush3.bf16.msra.mxu0 %v3628_v50  ;;  %v469_v60 = vcombine.high %v4516_v47, %v4516_v47  ;;  %v513_v6 = vld [vmem:[%s6133_s3 + $0x108] sm:$0xff]  ;;  %v499_v10 = vld [vmem:[%s6133_s3 + $0x98] sm:$0xff]  ;;  %v530_v14 = vld [vmem:[%s6133_s3 + $0x190] sm:$0xff] }
  0x37   : > { %3661 = vmatpush3.bf16.msra.mxu1 %v3660_v51  ;;  %3631 = vmatprep.subr.bf16.mxu0 %v3630_v52  ;;  %v549_v42 = vsub.s32 1, %v4493_v40  ;;  %v4500_v43 = vsub.s32 3, %v4493_v40  ;;  %v4511_v46 = vsub.s32 0, %v4493_v40  ;;  %v566_v52 = vcombine.high %v2517_v44, %v2517_v44  ;;  %v531_v15 = vld [vmem:[%s6133_s3 + $0x198] sm:$0xff]  ;;  %v482_v19 = vld [vmem:[%s6133_s3 + $0x10] sm:$0xff]  ;;  %v500_v26 = vld [vmem:[%s6133_s3 + $0xa0] sm:$0xff] }
  0x38   : > { %3663 = vmatprep.subr.bf16.mxu1 %v3662_v56  ;;  %v3712_v18 = vpack.c.bf16 %v513_v6, %v512_v5  ;;  %v514_v21 = vld [vmem:[%s6133_s3 + $0x110] sm:$0xff]  ;;  %v4574_v22 = vsub.s32 4, %v4493_v40  ;;  %v515_v25 = vld [vmem:[%s6133_s3 + $0x118] sm:$0xff]  ;;  %v501_v27 = vld [vmem:[%s6133_s3 + $0xa8] sm:$0xff]  ;;  %v3714_v31 = vpack.c.bf16 %v531_v15, %v530_v14 }
  0x39   : > { %v533_v33 = vld [vmem:[%s6133_s3 + $0x1a8] sm:$0xff]  ;;  %v3686_v37 = vpack.c.bf16 %v501_v27, %v500_v26  ;;  %v519_v5 = vld [vmem:[%s6133_s3 + $0x138] sm:$0xff]  ;;  %v504_v6 = vld [vmem:[%s6133_s3 + $0xc0] sm:$0xff] }
  0x3a   : > { %3633 = vmatpush3.bf16.msra.mxu0 %v3632_v62  ;;  %v485_v39 = vld [vmem:[%s6133_s3 + $0x28] sm:$0xff]  ;;  %v538_v26 = vld [vmem:[%s6133_s3 + $0x1d0] sm:$0xff]  ;;  %v539_v27 = vld [vmem:[%s6133_s3 + $0x1d8] sm:$0xff] }
  0x3b   : > { %3665 = vmatpush3.bf16.msra.mxu1 %v3664_v63  ;;  %3635 = vmatprep.subr.bf16.mxu0 %v3634_v1  ;;  %v480_v63 = vld [vmem:[%s6133_s3] sm:$0xff]  ;;  %v481_v1 = vld [vmem:[%s6133_s3 + $0x8] sm:$0xff] }
  0x3c   : > { %3667 = vmatprep.subr.bf16.mxu1 %v3666_v4 }
  0x3e   : > { %3637 = vmatpush3.bf16.msra.mxu0 %v3636_v7 }
  0x3f   : > { %3669 = vmatpush3.bf16.msra.mxu1 %v3668_v8  ;;  %3639 = vmatprep.subr.bf16.mxu0 %v3638_v12  ;;  %v3680_v12 = vpack.c.bf16 %v481_v1, %v480_v63  ;;  %v486_v1 = vld [vmem:[%s6133_s3 + $0x30] sm:$0xff] }
  0x40   : > { %3671 = vmatprep.subr.bf16.mxu1 %v3670_v16 }
  0x42   : > { %3641 = vmatpush3.bf16.msra.mxu0 %v3640_v17 }
  0x43   : > { %3673 = vmatpush3.bf16.msra.mxu1 %v3672_v20  ;;  %3643 = vmatprep.subr.bf16.mxu0 %v3642_v24  ;;  %v483_v20 = vld [vmem:[%s6133_s3 + $0x18] sm:$0xff]  ;;  %v3682_v24 = vpack.c.bf16 %v499_v10, %v498_v9  ;;  %v536_v10 = vld [vmem:[%s6133_s3 + $0x1c0] sm:$0xff] }
  0x44   : > { %3675 = vmatprep.subr.bf16.mxu1 %v3674_v28  ;;  %v3684_v35 = vpack.c.bf16 %v483_v20, %v482_v19  ;;  %v520_v19 = vld [vmem:[%s6133_s3 + $0x140] sm:$0xff] }
  0x46   : > { %3645 = vmatpush3.bf16.msra.mxu0 %v3644_v29 }
  0x47   : > { %3677 = vmatpush3.bf16.msra.mxu1 %v3676_v32  ;;  %3679 = vmatprep.subr.bf16.mxu0 %v3678_v36  ;;  %v532_v32 = vld [vmem:[%s6133_s3 + $0x1a0] sm:$0xff]  ;;  %v3716_v36 = vpack.c.bf16 %v515_v25, %v514_v21  ;;  %v521_v21 = vld [vmem:[%s6133_s3 + $0x148] sm:$0xff]  ;;  %v4679_v25 = vsub.s32 6, %v4493_v40 }
  0x48   : > { %3711 = vmatprep.subr.bf16.mxu1 %v3710_v38  ;;  %v484_v38 = vld [vmem:[%s6133_s3 + $0x20] sm:$0xff] }
  0xfc   : > { %v4518_v48 = vpop.f32.mrb[0].mxu0 }
  0xfd   : > { %v4520_v50 = vpop.f32.mrb[0].mxu1  ;;  %v4522_v51 = vpop.f32.mrb[1].mxu0  ;;  %v550_v53 = vrot.slane %v4518_v48, %v549_v42  ;;  %v1167_v55 = vrot.slane %v4518_v48, %v4500_v43 }
  0xfe   : > { %v4529_v56 = vpop.f32.mrb[1].mxu1  ;;  %v554_v57 = vrot.slane %v4522_v51, %v549_v42  ;;  %v558_v58 = vrot.slane %v4520_v50, %v549_v42  ;;  %v457_v59 = vrot.slane %v4522_v51, %v4511_v46  ;;  %v1171_v28 = vrot.slane %v4522_v51, %v4500_v43 }
  0xff   : > { %v562_v61 = vrot.slane %v4529_v56, %v549_v42  ;;  %v569_v62 = vadd.f32 %v2516_v41, %v550_v53  ;;  %v465_v2 = vrot.slane %v4529_v56, %v4511_v46  ;;  %v1179_v29 = vrot.slane %v4529_v56, %v4500_v43  ;;  %v516_v41 = vld [vmem:[%s6133_s3 + $0x120] sm:$0xff]  ;;  %v503_v53 = vld [vmem:[%s6133_s3 + $0xb8] sm:$0xff] }
 0x100   : > { %v570_v3 = vadd.f32 %v565_v49, %v554_v57  ;;  %v571_v4 = vadd.f32 %v2517_v44, %v558_v58  ;;  %v473_v8 = vadd.f32 %v468_v54, %v457_v59  ;;  %v1175_v42 = vrot.slane %v4520_v50, %v4500_v43  ;;  %v517_v49 = vld [vmem:[%s6133_s3 + $0x128] sm:$0xff]  ;;  %v534_v57 = vld [vmem:[%s6133_s3 + $0x1b0] sm:$0xff]  ;;  %v535_v58 = vld [vmem:[%s6133_s3 + $0x1b8] sm:$0xff] }
 0x101   : > { %v572_v7 = vadd.f32 %v566_v52, %v562_v61  ;;  %v475_v13 = vadd.f32 %v469_v60, %v465_v2  ;;  %v573_v17 = vmax.f32 %v569_v62, 0.0  ;;  %v3718_v44 = vpack.c.bf16 %v533_v33, %v532_v32  ;;  %v502_v52 = vld [vmem:[%s6133_s3 + $0xb0] sm:$0xff]  ;;  %v487_v2 = vld [vmem:[%s6133_s3 + $0x38] sm:$0xff] }
 0x102   : > { %v574_v11 = vmax.f32 %v570_v3, 0.0  ;;  %v575_v23 = vmax.f32 %v571_v4, 0.0  ;;  %v477_v30 = vmax.f32 %v473_v8, 0.0  ;;  %v1410_v54 = vrot.slane %v4522_v51, %v4574_v22  ;;  %v518_v3 = vld [vmem:[%s6133_s3 + $0x130] sm:$0xff]  ;;  %v2735_v43 = vld [vmem:[%s6133_s3 + $0x898] sm:$0xff] }
 0x103   : > { %v576_v16 = vmax.f32 %v572_v7, 0.0  ;;  %v479_v34 = vmax.f32 %v475_v13, 0.0  ;;  %v1418_v59 = vrot.slane %v4529_v56, %v4574_v22  ;;  %v4626_v60 = vsub.s32 5, %v4493_v40  ;;  %v505_v7 = vld [vmem:[%s6133_s3 + $0xc8] sm:$0xff]  ;;  %v490_v33 = vld [vmem:[%s6133_s3 + $0x50] sm:$0xff] }
 0x104   : > { %706 = vmatprep.mubr.f32.mxu0 %v574_v11  ;;  %v3688_v61 = vpack.c.bf16 %v485_v39, %v484_v38  ;;  %v3720_v62 = vpack.c.bf16 %v517_v49, %v516_v41  ;;  %v3690_v63 = vpack.c.bf16 %v503_v53, %v502_v52  ;;  %v3722_v4 = vpack.c.bf16 %v535_v58, %v534_v57  ;;  %v537_v11 = vld [vmem:[%s6133_s3 + $0x1c8] sm:$0xff]  ;;  %v508_v38 = vld [vmem:[%s6133_s3 + $0xe0] sm:$0xff] }
 0x105   : > { %776 = vmatprep.mubr.f32.mxu1 %v576_v16  ;;  %707 = vmatmul.mubr.f32.vlgmr.msra.gmra.mrb[2].mxu0 %v573_v17  ;;  %v1406_v8 = vrot.slane %v4518_v48, %v4574_v22  ;;  %v1414_v9 = vrot.slane %v4520_v50, %v4574_v22  ;;  %v3692_v13 = vpack.c.bf16 %v487_v2, %v486_v1  ;;  %v488_v17 = vld [vmem:[%s6133_s3 + $0x40] sm:$0xff]  ;;  %v509_v39 = vld [vmem:[%s6133_s3 + $0xe8] sm:$0xff]  ;;  %v4730_v2 = vsub.s32 7, %v4493_v40  ;;  %v2801_v22 = vld [vmem:[%s6133_s3 + $0xa98] sm:$0xff] }
 0x106   : > { %777 = vmatmul.mubr.f32.vlgmr.msra.gmra.mrb[2].mxu1 %v575_v23  ;;  %3681 = vmatpush3.bf16.msra.mxu0 %v3680_v12  ;;  %v1649_v12 = vrot.slane %v4522_v51, %v4626_v60  ;;  %v1657_v14 = vrot.slane %v4529_v56, %v4626_v60  ;;  %v3724_v15 = vpack.c.bf16 %v519_v5, %v518_v3  ;;  %v506_v23 = vld [vmem:[%s6133_s3 + $0xd0] sm:$0xff]  ;;  %v540_v52 = vld [vmem:[%s6133_s3 + $0x1e0] sm:$0xff]  ;;  %v541_v53 = vld [vmem:[%s6133_s3 + $0x1e8] sm:$0xff] }
 0x107   : > { %3713 = vmatpush3.bf16.msra.mxu1 %v3712_v18  ;;  %846 = vmatprep.mubr.f32.mxu0 %v477_v30  ;;  %v3694_v16 = vpack.c.bf16 %v505_v7, %v504_v6  ;;  %v489_v18 = vld [vmem:[%s6133_s3 + $0x48] sm:$0xff]  ;;  %v3726_v20 = vpack.c.bf16 %v537_v11, %v536_v10  ;;  %v1645_v41 = vrot.slane %v4518_v48, %v4626_v60  ;;  %v524_v5 = vld [vmem:[%s6133_s3 + $0x160] sm:$0xff]  ;;  %v510_v10 = vld [vmem:[%s6133_s3 + $0xf0] sm:$0xff] }
 0x108   : > { %916 = vmatprep.mubr.f32.mxu1 %v479_v34  ;;  %3683 = vmatprep.subr.bf16.mxu0 %v3682_v24  ;;  %v507_v24 = vld [vmem:[%s6133_s3 + $0xd8] sm:$0xff]  ;;  %v3696_v30 = vpack.c.bf16 %v489_v18, %v488_v17  ;;  %v1888_v49 = vrot.slane %v4522_v51, %v4679_v25  ;;  %v1896_v57 = vrot.slane %v4529_v56, %v4679_v25  ;;  %v525_v6 = vld [vmem:[%s6133_s3 + $0x168] sm:$0xff]  ;;  %v4751_v17 = vsub.s32 2, %v4493_v40 }
 0x109   : > { %3715 = vmatprep.subr.bf16.mxu1 %v3714_v31  ;;  %v3728_v31 = vpack.c.bf16 %v521_v21, %v520_v19  ;;  %v3698_v32 = vpack.c.bf16 %v507_v24, %v506_v23  ;;  %v491_v34 = vld [vmem:[%s6133_s3 + $0x58] sm:$0xff]  ;;  %v1884_v58 = vrot.slane %v4518_v48, %v4679_v25  ;;  %v1892_v1 = vrot.slane %v4520_v50, %v4679_v25  ;;  %v4756_v19 = vld [vmem:[%s6131_s1 + $0x20] sm:$0xff] }
 0x10a   : > { %3685 = vmatpush3.bf16.msra.mxu0 %v3684_v35  ;;  %v522_v35 = vld [vmem:[%s6133_s3 + $0x150] sm:$0xff]  ;;  %v3734_v7 = vpack.c.bf16 %v541_v53, %v540_v52  ;;  %v511_v11 = vld [vmem:[%s6133_s3 + $0xf8] sm:$0xff]  ;;  %v3736_v18 = vpack.c.bf16 %v525_v6, %v524_v5  ;;  %v2127_v21 = vrot.slane %v4522_v51, %v4730_v2  ;;  %v2135_v23 = vrot.slane %v4529_v56, %v4730_v2  ;;  %v2584_v5 = vld [vmem:[%s6133_s3 + $0x400] sm:$0xff] }
 0x10b   : > { %3717 = vmatpush3.bf16.msra.mxu1 %v3716_v36  ;;  %3687 = vmatprep.subr.bf16.mxu0 %v3686_v37  ;;  %v3730_v36 = vpack.c.bf16 %v539_v27, %v538_v26  ;;  %v523_v37 = vld [vmem:[%s6133_s3 + $0x158] sm:$0xff]  ;;  %v2123_v40 = vrot.slane %v4518_v48, %v4730_v2  ;;  %v3706_v24 = vpack.c.bf16 %v511_v11, %v510_v10  ;;  %v494_v26 = vld [vmem:[%s6133_s3 + $0x70] sm:$0xff]  ;;  %v2585_v6 = vld [vmem:[%s6133_s3 + $0x408] sm:$0xff] }
 0x10c   : > { %3719 = vmatprep.subr.bf16.mxu1 %v3718_v44  ;;  %v1653_v44 = vrot.slane %v4520_v50, %v4626_v60  ;;  %v3732_v3 = vpack.c.bf16 %v523_v37, %v522_v35  ;;  %v495_v27 = vld [vmem:[%s6133_s3 + $0x78] sm:$0xff]  ;;  %v461_v35 = vrot.slane %v4520_v50, %v4511_v46  ;;  %v2601_v37 = vld [vmem:[%s6133_s3 + $0x488] sm:$0xff]  ;;  %v932_v52 = vrot.slane %v4522_v51, %v4751_v17  ;;  %v2616_v11 = vld [vmem:[%s6133_s3 + $0x500] sm:$0xff] }
 0x10d   : > { %v3708_v53 = vpack.c.bf16 %v495_v27, %v494_v26  ;;  %v2635_v26 = vld [vmem:[%s6133_s3 + $0x598] sm:$0xff] }
 0x10e   : > { %3689 = vmatpush3.bf16.msra.mxu0 %v3688_v61  ;;  %v3700_v61 = vpack.c.bf16 %v491_v34, %v490_v33  ;;  %v527_v34 = vld [vmem:[%s6133_s3 + $0x178] sm:$0xff] }
 0x10f   : > { %3721 = vmatpush3.bf16.msra.mxu1 %v3720_v62  ;;  %3691 = vmatprep.subr.bf16.mxu0 %v3690_v63  ;;  %v492_v62 = vld [vmem:[%s6133_s3 + $0x60] sm:$0xff]  ;;  %v493_v63 = vld [vmem:[%s6133_s3 + $0x68] sm:$0xff]  ;;  %v2867_v60 = vld [vmem:[%s6133_s3 + $0xc98] sm:$0xff] }
 0x110   : > { %3723 = vmatprep.subr.bf16.mxu1 %v3722_v4  ;;  %v3702_v4 = vpack.c.bf16 %v509_v39, %v508_v38  ;;  %v2632_v38 = vld [vmem:[%s6133_s3 + $0x580] sm:$0xff]  ;;  %v2633_v39 = vld [vmem:[%s6133_s3 + $0x588] sm:$0xff]  ;;  %v2933_v25 = vld [vmem:[%s6133_s3 + $0xe98] sm:$0xff] }
 0x111   : > { %v3774_v10 = vpack.c.bf16 %v2633_v39, %v2632_v38  ;;  %v2604_v38 = vld [vmem:[%s6133_s3 + $0x4a0] sm:$0xff]  ;;  %v2605_v39 = vld [vmem:[%s6133_s3 + $0x4a8] sm:$0xff]  ;;  %v2965_v51 = vld [vmem:[%s6133_s3 + $0xf98] sm:$0xff] }
 0x112   : > { %3693 = vmatpush3.bf16.msra.mxu0 %v3692_v13  ;;  %v3704_v13 = vpack.c.bf16 %v493_v63, %v492_v62 }
 0x113   : > { %3725 = vmatpush3.bf16.msra.mxu1 %v3724_v15  ;;  %3695 = vmatprep.subr.bf16.mxu0 %v3694_v16  ;;  %v542_v15 = vld [vmem:[%s6133_s3 + $0x1f0] sm:$0xff]  ;;  %v543_v16 = vld [vmem:[%s6133_s3 + $0x1f8] sm:$0xff] }
 0x114   : > { %3727 = vmatprep.subr.bf16.mxu1 %v3726_v20  ;;  %v4761_v20 = vld [vmem:[%s6131_s1 + $0x28] sm:$0xff]  ;;  %v3738_v33 = vpack.c.bf16 %v543_v16, %v542_v15  ;;  %v2602_v15 = vld [vmem:[%s6133_s3 + $0x490] sm:$0xff]  ;;  %v2603_v16 = vld [vmem:[%s6133_s3 + $0x498] sm:$0xff] }
 0x115   : > { %v944_v62 = vcombine.high %v4761_v20, %v4761_v20 }
 0x116   : > { %3697 = vmatpush3.bf16.msra.mxu0 %v3696_v30  ;;  %v526_v30 = vld [vmem:[%s6133_s3 + $0x170] sm:$0xff] }
 0x117   : > { %3729 = vmatpush3.bf16.msra.mxu1 %v3728_v31  ;;  %3699 = vmatprep.subr.bf16.mxu0 %v3698_v32  ;;  %v453_v31 = vrot.slane %v4518_v48, %v4511_v46  ;;  %v2131_v32 = vrot.slane %v4520_v50, %v4730_v2  ;;  %v943_v46 = vcombine.high %v4756_v19, %v4756_v19 }
 0x118   : > { %3731 = vmatprep.subr.bf16.mxu1 %v3730_v36  ;;  %v2600_v36 = vld [vmem:[%s6133_s3 + $0x480] sm:$0xff]  ;;  %v3740_v63 = vpack.c.bf16 %v527_v34, %v526_v30  ;;  %v2618_v34 = vld [vmem:[%s6133_s3 + $0x510] sm:$0xff] }
 0x11a   : > { %3701 = vmatpush3.bf16.msra.mxu0 %v3700_v61  ;;  %v940_v61 = vrot.slane %v4529_v56, %v4751_v17  ;;  %v2917_v56 = vld [vmem:[%s6133_s3 + $0xe18] sm:$0xff] }
 0x11b   : > { %3733 = vmatpush3.bf16.msra.mxu1 %v3732_v3  ;;  %3703 = vmatprep.subr.bf16.mxu0 %v3702_v4  ;;  %v472_v3 = vadd.f32 %v453_v31, %v4508_v45  ;;  %v3742_v4 = vpack.c.bf16 %v2601_v37, %v2600_v36  ;;  %v2617_v45 = vld [vmem:[%s6133_s3 + $0x508] sm:$0xff]  ;;  %v2586_v31 = vld [vmem:[%s6133_s3 + $0x410] sm:$0xff]  ;;  %v3746_v36 = vpack.c.bf16 %v2603_v16, %v2602_v15  ;;  %v2619_v37 = vld [vmem:[%s6133_s3 + $0x518] sm:$0xff] }
 0x11c   : > { %3735 = vmatprep.subr.bf16.mxu1 %v3734_v7  ;;  %v474_v7 = vadd.f32 %v461_v35, %v4516_v47  ;;  %v3744_v47 = vpack.c.bf16 %v2585_v6, %v2584_v5  ;;  %v3776_v30 = vpack.c.bf16 %v2617_v45, %v2616_v11  ;;  %v2588_v5 = vld [vmem:[%s6133_s3 + $0x420] sm:$0xff]  ;;  %v2589_v6 = vld [vmem:[%s6133_s3 + $0x428] sm:$0xff]  ;;  %v2606_v45 = vld [vmem:[%s6133_s3 + $0x4b0] sm:$0xff] }
 0x11d   : > { %v476_v27 = vmax.f32 %v472_v3, 0.0  ;;  %v3780_v3 = vpack.c.bf16 %v2619_v37, %v2618_v34  ;;  %v2621_v11 = vld [vmem:[%s6133_s3 + $0x528] sm:$0xff]  ;;  %v2638_v15 = vld [vmem:[%s6133_s3 + $0x5b0] sm:$0xff]  ;;  %v2639_v16 = vld [vmem:[%s6133_s3 + $0x5b8] sm:$0xff] }
 0x11e   : > { %3705 = vmatpush3.bf16.msra.mxu0 %v3704_v13  ;;  %v948_v13 = vadd.f32 %v943_v46, %v932_v52  ;;  %v478_v35 = vmax.f32 %v474_v7, 0.0  ;;  %v2620_v7 = vld [vmem:[%s6133_s3 + $0x520] sm:$0xff]  ;;  %v2641_v37 = vld [vmem:[%s6133_s3 + $0x5c8] sm:$0xff] }
 0x11f   : > { %3737 = vmatpush3.bf16.msra.mxu1 %v3736_v18  ;;  %3707 = vmatprep.subr.bf16.mxu0 %v3706_v24  ;;  %v950_v18 = vadd.f32 %v944_v62, %v940_v61  ;;  %v2634_v24 = vld [vmem:[%s6133_s3 + $0x590] sm:$0xff]  ;;  %v2637_v61 = vld [vmem:[%s6133_s3 + $0x5a8] sm:$0xff]  ;;  %v2608_v34 = vld [vmem:[%s6133_s3 + $0x4c0] sm:$0xff] }
 0x120   : > { %3739 = vmatprep.subr.bf16.mxu1 %v3738_v33  ;;  %v2587_v33 = vld [vmem:[%s6133_s3 + $0x418] sm:$0xff]  ;;  %v952_v52 = vmax.f32 %v948_v13, 0.0  ;;  %v3778_v46 = vpack.c.bf16 %v2635_v26, %v2634_v24  ;;  %v2590_v26 = vld [vmem:[%s6133_s3 + $0x430] sm:$0xff] }
 0x121   : > { %v954_v62 = vmax.f32 %v950_v18, 0.0  ;;  %v2607_v13 = vld [vmem:[%s6133_s3 + $0x4b8] sm:$0xff]  ;;  %v3784_v18 = vpack.c.bf16 %v2621_v11, %v2620_v7 }
 0x122   : > { %3709 = vmatpush3.bf16.msra.mxu0 %v3708_v53  ;;  %v2636_v53 = vld [vmem:[%s6133_s3 + $0x5a0] sm:$0xff]  ;;  %v3754_v24 = vpack.c.bf16 %v2607_v13, %v2606_v45  ;;  %v2594_v45 = vld [vmem:[%s6133_s3 + $0x450] sm:$0xff]  ;;  %v2595_v13 = vld [vmem:[%s6133_s3 + $0x458] sm:$0xff] }
 0x123   : > { %3741 = vmatpush3.bf16.msra.mxu1 %v3740_v63  ;;  %3743 = vmatprep.subr.bf16.mxu0 %v3742_v4  ;;  %v3748_v63 = vpack.c.bf16 %v2587_v33, %v2586_v31  ;;  %v3750_v4 = vpack.c.bf16 %v2605_v39, %v2604_v38  ;;  %v3786_v31 = vpack.c.bf16 %v2639_v16, %v2638_v15  ;;  %v2623_v33 = vld [vmem:[%s6133_s3 + $0x538] sm:$0xff]  ;;  %v2626_v15 = vld [vmem:[%s6133_s3 + $0x550] sm:$0xff] }
 0x124   : > { %3775 = vmatprep.subr.bf16.mxu1 %v3774_v10  ;;  %v3782_v10 = vpack.c.bf16 %v2637_v61, %v2636_v53  ;;  %v2593_v53 = vld [vmem:[%s6133_s3 + $0x448] sm:$0xff]  ;;  %v2624_v61 = vld [vmem:[%s6133_s3 + $0x540] sm:$0xff] }
 0x125   : > { %847 = vmatmul.mubr.f32.vlgmr.msra.gmra.mrb[4].mxu0 %v476_v27  ;;  %v2591_v27 = vld [vmem:[%s6133_s3 + $0x438] sm:$0xff] }
 0x126   : > { %917 = vmatmul.mubr.f32.vlgmr.msra.gmra.mrb[4].mxu1 %v478_v35  ;;  %3745 = vmatpush3.bf16.msra.mxu0 %v3744_v47  ;;  %v3752_v47 = vpack.c.bf16 %v2589_v6, %v2588_v5  ;;  %v2609_v35 = vld [vmem:[%s6133_s3 + $0x4c8] sm:$0xff]  ;;  %v3756_v38 = vpack.c.bf16 %v2591_v27, %v2590_v26  ;;  %v2642_v5 = vld [vmem:[%s6133_s3 + $0x5d0] sm:$0xff]  ;;  %v2643_v6 = vld [vmem:[%s6133_s3 + $0x5d8] sm:$0xff] }
 0x127   : > { %1084 = vmatprep.mubr.f32.mxu0 %v952_v52  ;;  %3777 = vmatpush3.bf16.msra.mxu1 %v3776_v30  ;;  %v2622_v30 = vld [vmem:[%s6133_s3 + $0x530] sm:$0xff]  ;;  %v3758_v52 = vpack.c.bf16 %v2609_v35, %v2608_v34  ;;  %v3794_v16 = vpack.c.bf16 %v2643_v6, %v2642_v5  ;;  %v2644_v26 = vld [vmem:[%s6133_s3 + $0x5e0] sm:$0xff]  ;;  %v2645_v27 = vld [vmem:[%s6133_s3 + $0x5e8] sm:$0xff] }
 0x128   : > { %1154 = vmatprep.mubr.f32.mxu1 %v954_v62  ;;  %3747 = vmatprep.subr.bf16.mxu0 %v3746_v36  ;;  %v2640_v36 = vld [vmem:[%s6133_s3 + $0x5c0] sm:$0xff]  ;;  %v3788_v39 = vpack.c.bf16 %v2623_v33, %v2622_v30  ;;  %v3764_v30 = vpack.c.bf16 %v2595_v13, %v2594_v45  ;;  %v2597_v35 = vld [vmem:[%s6133_s3 + $0x468] sm:$0xff]  ;;  %v2598_v5 = vld [vmem:[%s6133_s3 + $0x470] sm:$0xff]  ;;  %v936_v13 = vrot.slane %v4520_v50, %v4751_v17 }
 0x129   : > { %3779 = vmatprep.subr.bf16.mxu1 %v3778_v46  ;;  %v2592_v46 = vld [vmem:[%s6133_s3 + $0x440] sm:$0xff]  ;;  %v3790_v62 = vpack.c.bf16 %v2641_v37, %v2640_v36  ;;  %v3798_v37 = vpack.c.bf16 %v2645_v27, %v2644_v26  ;;  %v2599_v6 = vld [vmem:[%s6133_s3 + $0x478] sm:$0xff] }
 0x12a   : > { %3749 = vmatpush3.bf16.msra.mxu0 %v3748_v63  ;;  %v2625_v63 = vld [vmem:[%s6133_s3 + $0x548] sm:$0xff]  ;;  %v3760_v7 = vpack.c.bf16 %v2593_v53, %v2592_v46  ;;  %v2596_v34 = vld [vmem:[%s6133_s3 + $0x460] sm:$0xff]  ;;  %v2646_v46 = vld [vmem:[%s6133_s3 + $0x5f0] sm:$0xff] }
 0x12b   : > { %3781 = vmatpush3.bf16.msra.mxu1 %v3780_v3  ;;  %3751 = vmatprep.subr.bf16.mxu0 %v3750_v4  ;;  %v2610_v3 = vld [vmem:[%s6133_s3 + $0x4d0] sm:$0xff]  ;;  %v2611_v4 = vld [vmem:[%s6133_s3 + $0x4d8] sm:$0xff]  ;;  %v2628_v36 = vld [vmem:[%s6133_s3 + $0x560] sm:$0xff] }
 0x12c   : > { %3783 = vmatprep.subr.bf16.mxu1 %v3782_v10  ;;  %v3792_v10 = vpack.c.bf16 %v2625_v63, %v2624_v61  ;;  %v3762_v11 = vpack.c.bf16 %v2611_v4, %v2610_v3  ;;  %v2647_v53 = vld [vmem:[%s6133_s3 + $0x5f8] sm:$0xff]  ;;  %v3768_v61 = vpack.c.bf16 %v2597_v35, %v2596_v34  ;;  %v2651_v34 = vld [vmem:[%s6133_s3 + $0x608] sm:$0xff]  ;;  %v949_v35 = vadd.f32 %v4761_v20, %v936_v13 }
 0x12d   : > { %v4985_v63 = vld [vmem:[%s6131_s1 + $0x38] sm:$0xff] }
 0x12e   : > { %3753 = vmatpush3.bf16.msra.mxu0 %v3752_v47  ;;  %v2627_v47 = vld [vmem:[%s6133_s3 + $0x558] sm:$0xff]  ;;  %v1183_v26 = vcombine.high %v4985_v63, %v4985_v63 }
 0x12f   : > { %3785 = vmatpush3.bf16.msra.mxu1 %v3784_v18  ;;  %3755 = vmatprep.subr.bf16.mxu0 %v3754_v24  ;;  %v2612_v18 = vld [vmem:[%s6133_s3 + $0x4e0] sm:$0xff]  ;;  %v2613_v24 = vld [vmem:[%s6133_s3 + $0x4e8] sm:$0xff]  ;;  %v2631_v45 = vld [vmem:[%s6133_s3 + $0x578] sm:$0xff] }
 0x130   : > { %3787 = vmatprep.subr.bf16.mxu1 %v3786_v31  ;;  %v3796_v31 = vpack.c.bf16 %v2627_v47, %v2626_v15  ;;  %v3766_v33 = vpack.c.bf16 %v2613_v24, %v2612_v18  ;;  %v2666_v15 = vld [vmem:[%s6133_s3 + $0x680] sm:$0xff]  ;;  %v2699_v18 = vld [vmem:[%s6133_s3 + $0x788] sm:$0xff]  ;;  %v2669_v20 = vld [vmem:[%s6133_s3 + $0x698] sm:$0xff] }
 0x131   : > { %v2698_v47 = vld [vmem:[%s6133_s3 + $0x780] sm:$0xff] }
 0x132   : > { %3757 = vmatpush3.bf16.msra.mxu0 %v3756_v38  ;;  %v2629_v38 = vld [vmem:[%s6133_s3 + $0x568] sm:$0xff] }
 0x133   : > { %3789 = vmatpush3.bf16.msra.mxu1 %v3788_v39  ;;  %3759 = vmatprep.subr.bf16.mxu0 %v3758_v52  ;;  %v2614_v39 = vld [vmem:[%s6133_s3 + $0x4f0] sm:$0xff]  ;;  %v2615_v52 = vld [vmem:[%s6133_s3 + $0x4f8] sm:$0xff]  ;;  %v3800_v3 = vpack.c.bf16 %v2629_v38, %v2628_v36  ;;  %v3838_v36 = vpack.c.bf16 %v2699_v18, %v2698_v47  ;;  %v2703_v47 = vld [vmem:[%s6133_s3 + $0x7a8] sm:$0xff] }
 0x134   : > { %3791 = vmatprep.subr.bf16.mxu1 %v3790_v62  ;;  %v4980_v62 = vld [vmem:[%s6131_s1 + $0x30] sm:$0xff]  ;;  %v3770_v4 = vpack.c.bf16 %v2615_v52, %v2614_v39 }
 0x135   : > { %v1182_v24 = vcombine.high %v4980_v62, %v4980_v62  ;;  %v2668_v39 = vld [vmem:[%s6133_s3 + $0x690] sm:$0xff] }
 0x136   : > { %3761 = vmatpush3.bf16.msra.mxu0 %v3760_v7  ;;  %v2630_v7 = vld [vmem:[%s6133_s3 + $0x570] sm:$0xff] }
 0x137   : > { %3793 = vmatpush3.bf16.msra.mxu1 %v3792_v10  ;;  %3763 = vmatprep.subr.bf16.mxu0 %v3762_v11  ;;  %v928_v10 = vrot.slane %v4518_v48, %v4751_v17  ;;  %v3802_v11 = vpack.c.bf16 %v2647_v53, %v2646_v46  ;;  %v3772_v17 = vpack.c.bf16 %v2599_v6, %v2598_v5  ;;  %v2700_v53 = vld [vmem:[%s6133_s3 + $0x790] sm:$0xff]  ;;  %v953_v6 = vmax.f32 %v949_v35, 0.0 }
 0x138   : > { %3795 = vmatprep.subr.bf16.mxu1 %v3794_v16  ;;  %v2667_v16 = vld [vmem:[%s6133_s3 + $0x688] sm:$0xff]  ;;  %v3804_v27 = vpack.c.bf16 %v2631_v45, %v2630_v7  ;;  %v1187_v38 = vadd.f32 %v1182_v24, %v1171_v28  ;;  %v1189_v46 = vadd.f32 %v1183_v26, %v1179_v29  ;;  %v2701_v28 = vld [vmem:[%s6133_s3 + $0x798] sm:$0xff]  ;;  %v2684_v5 = vld [vmem:[%s6133_s3 + $0x710] sm:$0xff]  ;;  %v3810_v7 = vpack.c.bf16 %v2669_v20, %v2668_v39 }
 0x139   : > { %v2653_v29 = vld [vmem:[%s6133_s3 + $0x618] sm:$0xff]  ;;  %v2671_v45 = vld [vmem:[%s6133_s3 + $0x6a8] sm:$0xff]  ;;  %v2672_v35 = vld [vmem:[%s6133_s3 + $0x6b0] sm:$0xff] }
 0x13a   : > { %3765 = vmatpush3.bf16.msra.mxu0 %v3764_v30  ;;  %v947_v30 = vadd.f32 %v4756_v19, %v928_v10  ;;  %v2683_v19 = vld [vmem:[%s6133_s3 + $0x708] sm:$0xff]  ;;  %v2685_v10 = vld [vmem:[%s6133_s3 + $0x718] sm:$0xff]  ;;  %v1191_v13 = vmax.f32 %v1187_v38, 0.0  ;;  %v1193_v18 = vmax.f32 %v1189_v46, 0.0 }
 0x13b   : > { %3797 = vmatpush3.bf16.msra.mxu1 %v3796_v31  ;;  %3767 = vmatprep.subr.bf16.mxu0 %v3766_v33  ;;  %v3806_v31 = vpack.c.bf16 %v2667_v16, %v2666_v15  ;;  %v2650_v33 = vld [vmem:[%s6133_s3 + $0x600] sm:$0xff]  ;;  %v3842_v15 = vpack.c.bf16 %v2701_v28, %v2700_v53  ;;  %v2657_v46 = vld [vmem:[%s6133_s3 + $0x638] sm:$0xff]  ;;  %v2688_v53 = vld [vmem:[%s6133_s3 + $0x730] sm:$0xff] }
 0x13c   : > { %3799 = vmatprep.subr.bf16.mxu1 %v3798_v37  ;;  %v2682_v37 = vld [vmem:[%s6133_s3 + $0x700] sm:$0xff]  ;;  %v3808_v52 = vpack.c.bf16 %v2651_v34, %v2650_v33  ;;  %v2687_v34 = vld [vmem:[%s6133_s3 + $0x728] sm:$0xff] }
 0x13d   : > { %v2702_v16 = vld [vmem:[%s6133_s3 + $0x7a0] sm:$0xff] }
 0x13e   : > { %3769 = vmatpush3.bf16.msra.mxu0 %v3768_v61  ;;  %v951_v61 = vmax.f32 %v947_v30, 0.0  ;;  %v2655_v30 = vld [vmem:[%s6133_s3 + $0x628] sm:$0xff]  ;;  %v3846_v33 = vpack.c.bf16 %v2703_v47, %v2702_v16  ;;  %v2676_v47 = vld [vmem:[%s6133_s3 + $0x6d0] sm:$0xff] }
 0x13f   : > { %3801 = vmatpush3.bf16.msra.mxu1 %v3800_v3  ;;  %3771 = vmatprep.subr.bf16.mxu0 %v3770_v4  ;;  %v3840_v3 = vpack.c.bf16 %v2683_v19, %v2682_v37  ;;  %v2652_v4 = vld [vmem:[%s6133_s3 + $0x610] sm:$0xff]  ;;  %v2705_v19 = vld [vmem:[%s6133_s3 + $0x7b8] sm:$0xff]  ;;  %v2691_v16 = vld [vmem:[%s6133_s3 + $0x748] sm:$0xff] }
 0x140   : > { %3803 = vmatprep.subr.bf16.mxu1 %v3802_v11  ;;  %v2670_v11 = vld [vmem:[%s6133_s3 + $0x6a0] sm:$0xff]  ;;  %v3812_v24 = vpack.c.bf16 %v2653_v29, %v2652_v4  ;;  %v2704_v37 = vld [vmem:[%s6133_s3 + $0x7b0] sm:$0xff]  ;;  %v2675_v4 = vld [vmem:[%s6133_s3 + $0x6c8] sm:$0xff] }
 0x141   : > { %v3814_v26 = vpack.c.bf16 %v2671_v45, %v2670_v11  ;;  %v3850_v28 = vpack.c.bf16 %v2705_v19, %v2704_v37  ;;  %v2706_v29 = vld [vmem:[%s6133_s3 + $0x7c0] sm:$0xff]  ;;  %v2659_v45 = vld [vmem:[%s6133_s3 + $0x648] sm:$0xff] }
 0x142   : > { %3773 = vmatpush3.bf16.msra.mxu0 %v3772_v17  ;;  %v3844_v17 = vpack.c.bf16 %v2685_v10, %v2684_v5  ;;  %v2707_v5 = vld [vmem:[%s6133_s3 + $0x7c8] sm:$0xff]  ;;  %v2658_v11 = vld [vmem:[%s6133_s3 + $0x640] sm:$0xff] }
 0x143   : > { %3805 = vmatpush3.bf16.msra.mxu1 %v3804_v27  ;;  %3807 = vmatprep.subr.bf16.mxu0 %v3806_v31  ;;  %v2654_v27 = vld [vmem:[%s6133_s3 + $0x620] sm:$0xff]  ;;  %v2679_v19 = vld [vmem:[%s6133_s3 + $0x6e8] sm:$0xff] }
 0x144   : > { %3839 = vmatprep.subr.bf16.mxu1 %v3838_v36  ;;  %v2686_v31 = vld [vmem:[%s6133_s3 + $0x720] sm:$0xff]  ;;  %v2673_v36 = vld [vmem:[%s6133_s3 + $0x6b8] sm:$0xff]  ;;  %v3816_v38 = vpack.c.bf16 %v2655_v30, %v2654_v27 }
 0x145   : > { %1085 = vmatmul.mubr.f32.vlgmr.msra.gmra.mrb[6].mxu0 %v951_v61  ;;  %v3848_v39 = vpack.c.bf16 %v2687_v34, %v2686_v31  ;;  %v3818_v20 = vpack.c.bf16 %v2673_v36, %v2672_v35  ;;  %v2689_v61 = vld [vmem:[%s6133_s3 + $0x738] sm:$0xff]  ;;  %v2660_v31 = vld [vmem:[%s6133_s3 + $0x650] sm:$0xff]  ;;  %v2678_v37 = vld [vmem:[%s6133_s3 + $0x6e0] sm:$0xff] }
 0x146   : > { %1155 = vmatmul.mubr.f32.vlgmr.msra.gmra.mrb[6].mxu1 %v953_v6  ;;  %3809 = vmatpush3.bf16.msra.mxu0 %v3808_v52  ;;  %v2656_v52 = vld [vmem:[%s6133_s3 + $0x630] sm:$0xff]  ;;  %v2693_v36 = vld [vmem:[%s6133_s3 + $0x758] sm:$0xff] }
 0x147   : > { %1323 = vmatprep.mubr.f32.mxu0 %v1191_v13  ;;  %3841 = vmatpush3.bf16.msra.mxu1 %v3840_v3  ;;  %v2674_v3 = vld [vmem:[%s6133_s3 + $0x6c0] sm:$0xff]  ;;  %v3820_v6 = vpack.c.bf16 %v2657_v46, %v2656_v52  ;;  %v2692_v34 = vld [vmem:[%s6133_s3 + $0x750] sm:$0xff]  ;;  %v3830_v46 = vpack.c.bf16 %v2679_v19, %v2678_v37  ;;  %v1186_v37 = vadd.f32 %v4980_v62, %v1167_v55  ;;  %v2749_v62 = vld [vmem:[%s6133_s3 + $0x908] sm:$0xff] }
 0x148   : > { %1393 = vmatprep.mubr.f32.mxu1 %v1193_v18  ;;  %3811 = vmatprep.subr.bf16.mxu0 %v3810_v7  ;;  %v3852_v7 = vpack.c.bf16 %v2689_v61, %v2688_v53  ;;  %v3822_v10 = vpack.c.bf16 %v2675_v4, %v2674_v3  ;;  %v2690_v13 = vld [vmem:[%s6133_s3 + $0x740] sm:$0xff]  ;;  %v2677_v18 = vld [vmem:[%s6133_s3 + $0x6d8] sm:$0xff]  ;;  %v3860_v52 = vpack.c.bf16 %v2693_v36, %v2692_v34  ;;  %v2695_v4 = vld [vmem:[%s6133_s3 + $0x768] sm:$0xff] }
 0x149   : > { %3843 = vmatprep.subr.bf16.mxu1 %v3842_v15  ;;  %v3854_v15 = vpack.c.bf16 %v2707_v5, %v2706_v29  ;;  %v3856_v27 = vpack.c.bf16 %v2691_v16, %v2690_v13  ;;  %v3826_v30 = vpack.c.bf16 %v2677_v18, %v2676_v47  ;;  %v2662_v53 = vld [vmem:[%s6133_s3 + $0x660] sm:$0xff]  ;;  %v2680_v29 = vld [vmem:[%s6133_s3 + $0x6f0] sm:$0xff]  ;;  %v2681_v5 = vld [vmem:[%s6133_s3 + $0x6f8] sm:$0xff] }
 0x14a   : > { %3813 = vmatpush3.bf16.msra.mxu0 %v3812_v24  ;;  %v2708_v24 = vld [vmem:[%s6133_s3 + $0x7d0] sm:$0xff]  ;;  %v2694_v61 = vld [vmem:[%s6133_s3 + $0x760] sm:$0xff]  ;;  %v2665_v47 = vld [vmem:[%s6133_s3 + $0x678] sm:$0xff] }
 0x14b   : > { %3845 = vmatpush3.bf16.msra.mxu1 %v3844_v17  ;;  %3815 = vmatprep.subr.bf16.mxu0 %v3814_v26  ;;  %v2709_v17 = vld [vmem:[%s6133_s3 + $0x7d8] sm:$0xff]  ;;  %v3824_v26 = vpack.c.bf16 %v2659_v45, %v2658_v11  ;;  %v5198_v11 = vld [vmem:[%s6131_s1 + $0x40] sm:$0xff]  ;;  %v5203_v45 = vld [vmem:[%s6131_s1 + $0x48] sm:$0xff]  ;;  %v3864_v13 = vpack.c.bf16 %v2695_v4, %v2694_v61  ;;  %v1190_v61 = vmax.f32 %v1186_v37, 0.0 }
 0x14c   : > { %3847 = vmatprep.subr.bf16.mxu1 %v3846_v33  ;;  %v2661_v33 = vld [vmem:[%s6133_s3 + $0x658] sm:$0xff]  ;;  %v3858_v35 = vpack.c.bf16 %v2709_v17, %v2708_v24  ;;  %v2664_v16 = vld [vmem:[%s6133_s3 + $0x670] sm:$0xff]  ;;  %v2748_v55 = vld [vmem:[%s6133_s3 + $0x900] sm:$0xff] }
 0x14d   : > { %v2696_v18 = vld [vmem:[%s6133_s3 + $0x770] sm:$0xff]  ;;  %v2697_v17 = vld [vmem:[%s6133_s3 + $0x778] sm:$0xff]  ;;  %v3836_v34 = vpack.c.bf16 %v2665_v47, %v2664_v16  ;;  %v2768_v47 = vld [vmem:[%s6133_s3 + $0x9a0] sm:$0xff] }
 0x14e   : > { %3817 = vmatpush3.bf16.msra.mxu0 %v3816_v38  ;;  %v2710_v38 = vld [vmem:[%s6133_s3 + $0x7e0] sm:$0xff]  ;;  %v3868_v36 = vpack.c.bf16 %v2697_v17, %v2696_v18  ;;  %v2718_v4 = vld [vmem:[%s6133_s3 + $0x810] sm:$0xff]  ;;  %v2769_v18 = vld [vmem:[%s6133_s3 + $0x9a8] sm:$0xff] }
 0x14f   : > { %3849 = vmatpush3.bf16.msra.mxu1 %v3848_v39  ;;  %3819 = vmatprep.subr.bf16.mxu0 %v3818_v20  ;;  %v2711_v39 = vld [vmem:[%s6133_s3 + $0x7e8] sm:$0xff]  ;;  %v3828_v20 = vpack.c.bf16 %v2661_v33, %v2660_v31  ;;  %v1421_v33 = vcombine.high %v5198_v11, %v5198_v11  ;;  %v2739_v37 = vld [vmem:[%s6133_s3 + $0x8b8] sm:$0xff] }
 0x150   : > { %3851 = vmatprep.subr.bf16.mxu1 %v3850_v28  ;;  %v2663_v28 = vld [vmem:[%s6133_s3 + $0x668] sm:$0xff]  ;;  %v3862_v3 = vpack.c.bf16 %v2711_v39, %v2710_v38  ;;  %v2716_v38 = vld [vmem:[%s6133_s3 + $0x800] sm:$0xff] }
 0x151   : > { %v2765_v31 = vld [vmem:[%s6133_s3 + $0x988] sm:$0xff] }
 0x152   : > { %3821 = vmatpush3.bf16.msra.mxu0 %v3820_v6  ;;  %v2712_v6 = vld [vmem:[%s6133_s3 + $0x7f0] sm:$0xff]  ;;  %v2717_v39 = vld [vmem:[%s6133_s3 + $0x808] sm:$0xff] }
 0x153   : > { %3853 = vmatpush3.bf16.msra.mxu1 %v3852_v7  ;;  %3823 = vmatprep.subr.bf16.mxu0 %v3822_v10  ;;  %v2713_v7 = vld [vmem:[%s6133_s3 + $0x7f8] sm:$0xff]  ;;  %v3832_v10 = vpack.c.bf16 %v2663_v28, %v2662_v53  ;;  %v2734_v53 = vld [vmem:[%s6133_s3 + $0x890] sm:$0xff] }
 0x154   : > { %3855 = vmatprep.subr.bf16.mxu1 %v3854_v15  ;;  %v3834_v15 = vpack.c.bf16 %v2681_v5, %v2680_v29  ;;  %v3866_v24 = vpack.c.bf16 %v2713_v7, %v2712_v6  ;;  %v2766_v28 = vld [vmem:[%s6133_s3 + $0x990] sm:$0xff]  ;;  %v3874_v6 = vpack.c.bf16 %v2735_v43, %v2734_v53  ;;  %v2751_v7 = vld [vmem:[%s6133_s3 + $0x918] sm:$0xff] }
 0x155   : > { %v2750_v29 = vld [vmem:[%s6133_s3 + $0x910] sm:$0xff]  ;;  %v2755_v43 = vld [vmem:[%s6133_s3 + $0x938] sm:$0xff] }
 0x156   : > { %3825 = vmatpush3.bf16.msra.mxu0 %v3824_v26  ;;  %v2732_v26 = vld [vmem:[%s6133_s3 + $0x880] sm:$0xff] }
 0x157   : > { %3857 = vmatpush3.bf16.msra.mxu1 %v3856_v27  ;;  %3827 = vmatprep.subr.bf16.mxu0 %v3826_v30  ;;  %v2733_v27 = vld [vmem:[%s6133_s3 + $0x888] sm:$0xff]  ;;  %v2764_v30 = vld [vmem:[%s6133_s3 + $0x980] sm:$0xff] }
 0x158   : > { %3859 = vmatprep.subr.bf16.mxu1 %v3858_v35  ;;  %v1422_v35 = vcombine.high %v5203_v45, %v5203_v45  ;;  %v3870_v19 = vpack.c.bf16 %v2733_v27, %v2732_v26  ;;  %v3908_v26 = vpack.c.bf16 %v2751_v7, %v2750_v29  ;;  %v2725_v29 = vld [vmem:[%s6133_s3 + $0x848] sm:$0xff] }
 0x159   : > { %v2757_v7 = vld [vmem:[%s6133_s3 + $0x948] sm:$0xff] }
 0x15a   : > { %3829 = vmatpush3.bf16.msra.mxu0 %v3828_v20  ;;  %v1188_v20 = vadd.f32 %v4985_v63, %v1175_v42  ;;  %v3872_v42 = vpack.c.bf16 %v2717_v39, %v2716_v38  ;;  %v1428_v63 = vadd.f32 %v1422_v35, %v1418_v59  ;;  %v2719_v59 = vld [vmem:[%s6133_s3 + $0x818] sm:$0xff]  ;;  %v2753_v35 = vld [vmem:[%s6133_s3 + $0x928] sm:$0xff] }
 0x15b   : > { %3861 = vmatpush3.bf16.msra.mxu1 %v3860_v52  ;;  %3831 = vmatprep.subr.bf16.mxu0 %v3830_v46  ;;  %v3902_v52 = vpack.c.bf16 %v2765_v31, %v2764_v30  ;;  %v1426_v46 = vadd.f32 %v1421_v33, %v1410_v54  ;;  %v2767_v54 = vld [vmem:[%s6133_s3 + $0x998] sm:$0xff]  ;;  %v3876_v17 = vpack.c.bf16 %v2719_v59, %v2718_v4  ;;  %v2720_v30 = vld [vmem:[%s6133_s3 + $0x820] sm:$0xff]  ;;  %v2721_v31 = vld [vmem:[%s6133_s3 + $0x828] sm:$0xff] }
 0x15c   : > { %3863 = vmatprep.subr.bf16.mxu1 %v3862_v3  ;;  %v3904_v3 = vpack.c.bf16 %v2749_v62, %v2748_v55  ;;  %v1192_v5 = vmax.f32 %v1188_v20, 0.0  ;;  %v3906_v16 = vpack.c.bf16 %v2767_v54, %v2766_v28  ;;  %v2752_v33 = vld [vmem:[%s6133_s3 + $0x920] sm:$0xff]  ;;  %v2771_v38 = vld [vmem:[%s6133_s3 + $0x9b8] sm:$0xff]  ;;  %v3880_v39 = vpack.c.bf16 %v2721_v31, %v2720_v30  ;;  %v2722_v55 = vld [vmem:[%s6133_s3 + $0x830] sm:$0xff] }
 0x15d   : > { %v3912_v20 = vpack.c.bf16 %v2753_v35, %v2752_v33  ;;  %v2723_v62 = vld [vmem:[%s6133_s3 + $0x838] sm:$0xff]  ;;  %v2772_v28 = vld [vmem:[%s6133_s3 + $0x9c0] sm:$0xff]  ;;  %v2773_v54 = vld [vmem:[%s6133_s3 + $0x9c8] sm:$0xff] }
 0x15e   : > { %3833 = vmatpush3.bf16.msra.mxu0 %v3832_v10  ;;  %v2736_v10 = vld [vmem:[%s6133_s3 + $0x8a0] sm:$0xff]  ;;  %v2759_v31 = vld [vmem:[%s6133_s3 + $0x958] sm:$0xff] }
 0x15f   : > { %3865 = vmatpush3.bf16.msra.mxu1 %v3864_v13  ;;  %3835 = vmatprep.subr.bf16.mxu0 %v3834_v15  ;;  %v2737_v13 = vld [vmem:[%s6133_s3 + $0x8a8] sm:$0xff]  ;;  %v1430_v15 = vmax.f32 %v1426_v46, 0.0  ;;  %v2754_v46 = vld [vmem:[%s6133_s3 + $0x930] sm:$0xff]  ;;  %v2724_v59 = vld [vmem:[%s6133_s3 + $0x840] sm:$0xff] }
 0x160   : > { %3867 = vmatprep.subr.bf16.mxu1 %v3866_v24  ;;  %v1432_v24 = vmax.f32 %v1428_v63, 0.0  ;;  %v3878_v27 = vpack.c.bf16 %v2737_v13, %v2736_v10  ;;  %v2741_v63 = vld [vmem:[%s6133_s3 + $0x8c8] sm:$0xff]  ;;  %v2742_v10 = vld [vmem:[%s6133_s3 + $0x8d0] sm:$0xff]  ;;  %v2743_v13 = vld [vmem:[%s6133_s3 + $0x8d8] sm:$0xff] }
 0x161   : > { %v2744_v33 = vld [vmem:[%s6133_s3 + $0x8e0] sm:$0xff] }
 0x162   : > { %3837 = vmatpush3.bf16.msra.mxu0 %v3836_v34  ;;  %v3910_v34 = vpack.c.bf16 %v2769_v18, %v2768_v47  ;;  %v3888_v47 = vpack.c.bf16 %v2725_v29, %v2724_v59  ;;  %v2776_v35 = vld [vmem:[%s6133_s3 + $0x9e0] sm:$0xff]  ;;  %v2731_v59 = vld [vmem:[%s6133_s3 + $0x878] sm:$0xff]  ;;  %v2762_v29 = vld [vmem:[%s6133_s3 + $0x970] sm:$0xff] }
 0x163   : > { %3869 = vmatpush3.bf16.msra.mxu1 %v3868_v36  ;;  %3871 = vmatprep.subr.bf16.mxu0 %v3870_v19  ;;  %v2738_v36 = vld [vmem:[%s6133_s3 + $0x8b0] sm:$0xff] }
 0x164   : > { %3903 = vmatprep.subr.bf16.mxu1 %v3902_v52  ;;  %v2770_v19 = vld [vmem:[%s6133_s3 + $0x9b0] sm:$0xff]  ;;  %v3882_v52 = vpack.c.bf16 %v2739_v37, %v2738_v36  ;;  %v2777_v36 = vld [vmem:[%s6133_s3 + $0x9e8] sm:$0xff] }
 0x165   : > { %1324 = vmatmul.mubr.f32.vlgmr.msra.gmra.mrb[8].mxu0 %v1190_v61  ;;  %v3914_v53 = vpack.c.bf16 %v2771_v38, %v2770_v19  ;;  %v3884_v61 = vpack.c.bf16 %v2723_v62, %v2722_v55  ;;  %v3926_v55 = vpack.c.bf16 %v2777_v36, %v2776_v35  ;;  %v2761_v62 = vld [vmem:[%s6133_s3 + $0x968] sm:$0xff]  ;;  %v2800_v35 = vld [vmem:[%s6133_s3 + $0xa90] sm:$0xff] }
 0x166   : > { %1394 = vmatmul.mubr.f32.vlgmr.msra.gmra.mrb[8].mxu1 %v1192_v5  ;;  %3873 = vmatpush3.bf16.msra.mxu0 %v3872_v42  ;;  %v2740_v42 = vld [vmem:[%s6133_s3 + $0x8c0] sm:$0xff]  ;;  %v2832_v36 = vld [vmem:[%s6133_s3 + $0xb90] sm:$0xff] }
 0x167   : > { %1562 = vmatprep.mubr.f32.mxu0 %v1430_v15  ;;  %3905 = vmatpush3.bf16.msra.mxu1 %v3904_v3  ;;  %v3916_v3 = vpack.c.bf16 %v2755_v43, %v2754_v46  ;;  %v3886_v4 = vpack.c.bf16 %v2741_v63, %v2740_v42  ;;  %v2756_v5 = vld [vmem:[%s6133_s3 + $0x940] sm:$0xff]  ;;  %v2774_v15 = vld [vmem:[%s6133_s3 + $0x9d0] sm:$0xff]  ;;  %v2779_v42 = vld [vmem:[%s6133_s3 + $0x9f8] sm:$0xff] }
 0x168   : > { %1632 = vmatprep.mubr.f32.mxu1 %v1432_v24  ;;  %3875 = vmatprep.subr.bf16.mxu0 %v3874_v6  ;;  %v3918_v6 = vpack.c.bf16 %v2773_v54, %v2772_v28  ;;  %v3920_v18 = vpack.c.bf16 %v2757_v7, %v2756_v5  ;;  %v3890_v24 = vpack.c.bf16 %v2743_v13, %v2742_v10  ;;  %v2746_v46 = vld [vmem:[%s6133_s3 + $0x8f0] sm:$0xff]  ;;  %v5423_v54 = vld [vmem:[%s6131_s1 + $0x58] sm:$0xff]  ;;  %v2798_v7 = vld [vmem:[%s6133_s3 + $0xa80] sm:$0xff] }
 0x169   : > { %3907 = vmatprep.subr.bf16.mxu1 %v3906_v16  ;;  %v2775_v16 = vld [vmem:[%s6133_s3 + $0x9d8] sm:$0xff]  ;;  %v2778_v43 = vld [vmem:[%s6133_s3 + $0x9f0] sm:$0xff]  ;;  %v2799_v10 = vld [vmem:[%s6133_s3 + $0xa88] sm:$0xff] }
 0x16a   : > { %3877 = vmatpush3.bf16.msra.mxu0 %v3876_v17  ;;  %v2726_v17 = vld [vmem:[%s6133_s3 + $0x850] sm:$0xff]  ;;  %v3922_v30 = vpack.c.bf16 %v2775_v16, %v2774_v15  ;;  %v3930_v5 = vpack.c.bf16 %v2779_v42, %v2778_v43  ;;  %v2830_v13 = vld [vmem:[%s6133_s3 + $0xb80] sm:$0xff]  ;;  %v2831_v15 = vld [vmem:[%s6133_s3 + $0xb88] sm:$0xff] }
 0x16b   : > { %3909 = vmatpush3.bf16.msra.mxu1 %v3908_v26  ;;  %3879 = vmatprep.subr.bf16.mxu0 %v3878_v27  ;;  %v2727_v26 = vld [vmem:[%s6133_s3 + $0x858] sm:$0xff]  ;;  %v2758_v27 = vld [vmem:[%s6133_s3 + $0x950] sm:$0xff]  ;;  %v2834_v42 = vld [vmem:[%s6133_s3 + $0xba0] sm:$0xff] }
 0x16c   : > { %3911 = vmatprep.subr.bf16.mxu1 %v3910_v34  ;;  %v2745_v34 = vld [vmem:[%s6133_s3 + $0x8e8] sm:$0xff]  ;;  %v3892_v37 = vpack.c.bf16 %v2727_v26, %v2726_v17  ;;  %v3924_v19 = vpack.c.bf16 %v2759_v31, %v2758_v27  ;;  %v5418_v28 = vld [vmem:[%s6131_s1 + $0x50] sm:$0xff]  ;;  %v1425_v17 = vadd.f32 %v5198_v11, %v1406_v8  ;;  %v3934_v26 = vpack.c.bf16 %v2799_v10, %v2798_v7  ;;  %v2782_v27 = vld [vmem:[%s6133_s3 + $0xa00] sm:$0xff] }
 0x16d   : > { %v3894_v38 = vpack.c.bf16 %v2745_v34, %v2744_v33  ;;  %v1660_v16 = vcombine.high %v5418_v28, %v5418_v28  ;;  %v1427_v31 = vadd.f32 %v5203_v45, %v1414_v9  ;;  %v3966_v33 = vpack.c.bf16 %v2831_v15, %v2830_v13  ;;  %v2814_v8 = vld [vmem:[%s6133_s3 + $0xb00] sm:$0xff]  ;;  %v2815_v11 = vld [vmem:[%s6133_s3 + $0xb08] sm:$0xff]  ;;  %v2804_v13 = vld [vmem:[%s6133_s3 + $0xab0] sm:$0xff] }
 0x16e   : > { %3881 = vmatpush3.bf16.msra.mxu0 %v3880_v39  ;;  %v2728_v39 = vld [vmem:[%s6133_s3 + $0x860] sm:$0xff]  ;;  %v2819_v10 = vld [vmem:[%s6133_s3 + $0xb28] sm:$0xff]  ;;  %v2805_v15 = vld [vmem:[%s6133_s3 + $0xab8] sm:$0xff] }
 0x16f   : > { %3913 = vmatpush3.bf16.msra.mxu1 %v3912_v20  ;;  %3883 = vmatprep.subr.bf16.mxu0 %v3882_v52  ;;  %v2729_v20 = vld [vmem:[%s6133_s3 + $0x868] sm:$0xff]  ;;  %v2760_v52 = vld [vmem:[%s6133_s3 + $0x960] sm:$0xff]  ;;  %v1665_v34 = vadd.f32 %v1660_v16, %v1649_v12  ;;  %v2833_v12 = vld [vmem:[%s6133_s3 + $0xb98] sm:$0xff] }
 0x170   : > { %3915 = vmatprep.subr.bf16.mxu1 %v3914_v53  ;;  %v2747_v53 = vld [vmem:[%s6133_s3 + $0x8f8] sm:$0xff]  ;;  %v3896_v63 = vpack.c.bf16 %v2729_v20, %v2728_v39  ;;  %v2816_v39 = vld [vmem:[%s6133_s3 + $0xb10] sm:$0xff]  ;;  %v1431_v20 = vmax.f32 %v1427_v31, 0.0  ;;  %v3970_v43 = vpack.c.bf16 %v2833_v12, %v2832_v36  ;;  %v2790_v36 = vld [vmem:[%s6133_s3 + $0xa40] sm:$0xff] }
 0x171   : > { %v2836_v16 = vld [vmem:[%s6133_s3 + $0xbb0] sm:$0xff]  ;;  %v2791_v12 = vld [vmem:[%s6133_s3 + $0xa48] sm:$0xff] }
 0x172   : > { %3885 = vmatpush3.bf16.msra.mxu0 %v3884_v61  ;;  %v3928_v61 = vpack.c.bf16 %v2761_v62, %v2760_v52  ;;  %v3938_v52 = vpack.c.bf16 %v2801_v22, %v2800_v35  ;;  %v2802_v62 = vld [vmem:[%s6133_s3 + $0xaa0] sm:$0xff]  ;;  %v2839_v35 = vld [vmem:[%s6133_s3 + $0xbc8] sm:$0xff] }
 0x173   : > { %3917 = vmatpush3.bf16.msra.mxu1 %v3916_v3  ;;  %3887 = vmatprep.subr.bf16.mxu0 %v3886_v4  ;;  %v3898_v3 = vpack.c.bf16 %v2747_v53, %v2746_v46  ;;  %v2730_v4 = vld [vmem:[%s6133_s3 + $0x870] sm:$0xff]  ;;  %v2803_v46 = vld [vmem:[%s6133_s3 + $0xaa8] sm:$0xff]  ;;  %v1669_v53 = vmax.f32 %v1665_v34, 0.0  ;;  %v2838_v34 = vld [vmem:[%s6133_s3 + $0xbc0] sm:$0xff] }
 0x174   : > { %3919 = vmatprep.subr.bf16.mxu1 %v3918_v6  ;;  %v2763_v6 = vld [vmem:[%s6133_s3 + $0x978] sm:$0xff] }
 0x176   : > { %3889 = vmatpush3.bf16.msra.mxu0 %v3888_v47  ;;  %v3900_v47 = vpack.c.bf16 %v2731_v59, %v2730_v4  ;;  %v3942_v59 = vpack.c.bf16 %v2803_v46, %v2802_v62 }
 0x177   : > { %3921 = vmatpush3.bf16.msra.mxu1 %v3920_v18  ;;  %3891 = vmatprep.subr.bf16.mxu0 %v3890_v24  ;;  %v1661_v18 = vcombine.high %v5423_v54, %v5423_v54  ;;  %v3932_v24 = vpack.c.bf16 %v2763_v6, %v2762_v29  ;;  %v2786_v29 = vld [vmem:[%s6133_s3 + $0xa20] sm:$0xff] }
 0x178   : > { %3923 = vmatprep.subr.bf16.mxu1 %v3922_v30  ;;  %v2783_v30 = vld [vmem:[%s6133_s3 + $0xa08] sm:$0xff]  ;;  %v2818_v6 = vld [vmem:[%s6133_s3 + $0xb20] sm:$0xff] }
 0x179   : > { %v3936_v9 = vpack.c.bf16 %v2783_v30, %v2782_v27  ;;  %v1667_v45 = vadd.f32 %v1661_v18, %v1657_v14  ;;  %v2785_v14 = vld [vmem:[%s6133_s3 + $0xa18] sm:$0xff]  ;;  %v2820_v30 = vld [vmem:[%s6133_s3 + $0xb30] sm:$0xff] }
 0x17a   : > { %3893 = vmatpush3.bf16.msra.mxu0 %v3892_v37  ;;  %v1429_v37 = vmax.f32 %v1425_v17, 0.0  ;;  %v3946_v17 = vpack.c.bf16 %v2805_v15, %v2804_v13  ;;  %v2789_v27 = vld [vmem:[%s6133_s3 + $0xa38] sm:$0xff]  ;;  %v2795_v13 = vld [vmem:[%s6133_s3 + $0xa68] sm:$0xff]  ;;  %v2826_v15 = vld [vmem:[%s6133_s3 + $0xb60] sm:$0xff] }
 0x17b   : > { %3925 = vmatpush3.bf16.msra.mxu1 %v3924_v19  ;;  %3895 = vmatprep.subr.bf16.mxu0 %v3894_v38  ;;  %v3968_v19 = vpack.c.bf16 %v2815_v11, %v2814_v8  ;;  %v2784_v38 = vld [vmem:[%s6133_s3 + $0xa10] sm:$0xff]  ;;  %v2806_v8 = vld [vmem:[%s6133_s3 + $0xac0] sm:$0xff]  ;;  %v2807_v11 = vld [vmem:[%s6133_s3 + $0xac8] sm:$0xff] }
 0x17c   : > { %3927 = vmatprep.subr.bf16.mxu1 %v3926_v55  ;;  %v2817_v55 = vld [vmem:[%s6133_s3 + $0xb18] sm:$0xff] }
 0x17d   : > { %v3972_v4 = vpack.c.bf16 %v2817_v55, %v2816_v39  ;;  %v2809_v39 = vld [vmem:[%s6133_s3 + $0xad8] sm:$0xff]  ;;  %v3952_v55 = vpack.c.bf16 %v2791_v12, %v2790_v36  ;;  %v2865_v36 = vld [vmem:[%s6133_s3 + $0xc88] sm:$0xff]  ;;  %v2896_v12 = vld [vmem:[%s6133_s3 + $0xd80] sm:$0xff] }
 0x17e   : > { %3897 = vmatpush3.bf16.msra.mxu0 %v3896_v63  ;;  %v2835_v63 = vld [vmem:[%s6133_s3 + $0xba8] sm:$0xff] }
 0x17f   : > { %3929 = vmatpush3.bf16.msra.mxu1 %v3928_v61  ;;  %3899 = vmatprep.subr.bf16.mxu0 %v3898_v3  ;;  %v1671_v61 = vmax.f32 %v1667_v45, 0.0  ;;  %v3940_v3 = vpack.c.bf16 %v2785_v14, %v2784_v38  ;;  %v3974_v7 = vpack.c.bf16 %v2835_v63, %v2834_v42  ;;  %v3950_v45 = vpack.c.bf16 %v2807_v11, %v2806_v8  ;;  %v2823_v38 = vld [vmem:[%s6133_s3 + $0xb48] sm:$0xff]  ;;  %v2808_v14 = vld [vmem:[%s6133_s3 + $0xad0] sm:$0xff] }
 0x180   : > { %3931 = vmatprep.subr.bf16.mxu1 %v3930_v5  ;;  %v2787_v5 = vld [vmem:[%s6133_s3 + $0xa28] sm:$0xff]  ;;  %v3954_v46 = vpack.c.bf16 %v2809_v39, %v2808_v14  ;;  %v2824_v42 = vld [vmem:[%s6133_s3 + $0xb50] sm:$0xff] }
 0x181   : > { %v3944_v18 = vpack.c.bf16 %v2787_v5, %v2786_v29  ;;  %v2843_v29 = vld [vmem:[%s6133_s3 + $0xbe8] sm:$0xff]  ;;  %v2796_v11 = vld [vmem:[%s6133_s3 + $0xa70] sm:$0xff] }
 0x182   : > { %3901 = vmatpush3.bf16.msra.mxu0 %v3900_v47  ;;  %v2837_v47 = vld [vmem:[%s6133_s3 + $0xbb8] sm:$0xff] }
 0x183   : > { %3933 = vmatpush3.bf16.msra.mxu1 %v3932_v24  ;;  %3935 = vmatprep.subr.bf16.mxu0 %v3934_v26  ;;  %v3976_v24 = vpack.c.bf16 %v2819_v10, %v2818_v6  ;;  %v2788_v26 = vld [vmem:[%s6133_s3 + $0xa30] sm:$0xff]  ;;  %v3978_v31 = vpack.c.bf16 %v2837_v47, %v2836_v16  ;;  %v2794_v10 = vld [vmem:[%s6133_s3 + $0xa60] sm:$0xff]  ;;  %v2827_v47 = vld [vmem:[%s6133_s3 + $0xb68] sm:$0xff] }
 0x184   : > { %3967 = vmatprep.subr.bf16.mxu1 %v3966_v33  ;;  %v2821_v33 = vld [vmem:[%s6133_s3 + $0xb38] sm:$0xff]  ;;  %v3948_v22 = vpack.c.bf16 %v2789_v27, %v2788_v26  ;;  %v3960_v27 = vpack.c.bf16 %v2795_v13, %v2794_v10  ;;  %v2869_v10 = vld [vmem:[%s6133_s3 + $0xca8] sm:$0xff] }
 0x185   : > { %1563 = vmatmul.mubr.f32.vlgmr.msra.gmra.mrb[10].mxu0 %v1429_v37  ;;  %v2822_v37 = vld [vmem:[%s6133_s3 + $0xb40] sm:$0xff]  ;;  %v2845_v26 = vld [vmem:[%s6133_s3 + $0xbf8] sm:$0xff] }
 0x186   : > { %1633 = vmatmul.mubr.f32.vlgmr.msra.gmra.mrb[10].mxu1 %v1431_v20  ;;  %3937 = vmatpush3.bf16.msra.mxu0 %v3936_v9  ;;  %v3980_v9 = vpack.c.bf16 %v2821_v33, %v2820_v30  ;;  %v2840_v20 = vld [vmem:[%s6133_s3 + $0xbd0] sm:$0xff]  ;;  %v3984_v62 = vpack.c.bf16 %v2823_v38, %v2822_v37  ;;  %v5638_v30 = vld [vmem:[%s6131_s1 + $0x60] sm:$0xff]  ;;  %v3992_v33 = vpack.c.bf16 %v2827_v47, %v2826_v15  ;;  %v2897_v37 = vld [vmem:[%s6133_s3 + $0xd88] sm:$0xff] }
 0x187   : > { %1801 = vmatprep.mubr.f32.mxu0 %v1669_v53  ;;  %3969 = vmatpush3.bf16.msra.mxu1 %v3968_v19  ;;  %v3982_v19 = vpack.c.bf16 %v2839_v35, %v2838_v34  ;;  %v2792_v53 = vld [vmem:[%s6133_s3 + $0xa50] sm:$0xff]  ;;  %v2797_v34 = vld [vmem:[%s6133_s3 + $0xa78] sm:$0xff]  ;;  %v2901_v47 = vld [vmem:[%s6133_s3 + $0xda8] sm:$0xff] }
 0x188   : > { %1871 = vmatprep.mubr.f32.mxu1 %v1671_v61  ;;  %3939 = vmatprep.subr.bf16.mxu0 %v3938_v52  ;;  %v2841_v52 = vld [vmem:[%s6133_s3 + $0xbd8] sm:$0xff]  ;;  %v2828_v35 = vld [vmem:[%s6133_s3 + $0xb70] sm:$0xff]  ;;  %v3964_v38 = vpack.c.bf16 %v2797_v34, %v2796_v11  ;;  %v2885_v34 = vld [vmem:[%s6133_s3 + $0xd28] sm:$0xff] }
 0x189   : > { %3971 = vmatprep.subr.bf16.mxu1 %v3970_v43  ;;  %v2793_v43 = vld [vmem:[%s6133_s3 + $0xa58] sm:$0xff]  ;;  %v3986_v63 = vpack.c.bf16 %v2841_v52, %v2840_v20  ;;  %v1664_v20 = vadd.f32 %v5418_v28, %v1645_v41  ;;  %v2880_v41 = vld [vmem:[%s6133_s3 + $0xd00] sm:$0xff]  ;;  %v2881_v28 = vld [vmem:[%s6133_s3 + $0xd08] sm:$0xff] }
 0x18a   : > { %3941 = vmatpush3.bf16.msra.mxu0 %v3940_v3  ;;  %v2825_v61 = vld [vmem:[%s6133_s3 + $0xb58] sm:$0xff]  ;;  %v2810_v3 = vld [vmem:[%s6133_s3 + $0xae0] sm:$0xff]  ;;  %v3956_v5 = vpack.c.bf16 %v2793_v43, %v2792_v53  ;;  %v4030_v53 = vpack.c.bf16 %v2897_v37, %v2896_v12 }
 0x18b   : > { %3973 = vmatpush3.bf16.msra.mxu1 %v3972_v4  ;;  %3943 = vmatprep.subr.bf16.mxu0 %v3942_v59  ;;  %v2811_v4 = vld [vmem:[%s6133_s3 + $0xae8] sm:$0xff]  ;;  %v2842_v59 = vld [vmem:[%s6133_s3 + $0xbe0] sm:$0xff]  ;;  %v3988_v6 = vpack.c.bf16 %v2825_v61, %v2824_v42  ;;  %v2866_v42 = vld [vmem:[%s6133_s3 + $0xc90] sm:$0xff]  ;;  %v1668_v61 = vmax.f32 %v1664_v20, 0.0 }
 0x18c   : > { %3975 = vmatprep.subr.bf16.mxu1 %v3974_v7  ;;  %v3958_v7 = vpack.c.bf16 %v2811_v4, %v2810_v3  ;;  %v3990_v16 = vpack.c.bf16 %v2843_v29, %v2842_v59  ;;  %v4032_v3 = vpack.c.bf16 %v2881_v28, %v2880_v41  ;;  %v2850_v4 = vld [vmem:[%s6133_s3 + $0xc10] sm:$0xff]  ;;  %v2887_v20 = vld [vmem:[%s6133_s3 + $0xd38] sm:$0xff] }
 0x18d   : > { %v2882_v59 = vld [vmem:[%s6133_s3 + $0xd10] sm:$0xff] }
 0x18e   : > { %3945 = vmatpush3.bf16.msra.mxu0 %v3944_v18  ;;  %v2812_v18 = vld [vmem:[%s6133_s3 + $0xaf0] sm:$0xff] }
 0x18f   : > { %3977 = vmatpush3.bf16.msra.mxu1 %v3976_v24  ;;  %3947 = vmatprep.subr.bf16.mxu0 %v3946_v17  ;;  %v2813_v24 = vld [vmem:[%s6133_s3 + $0xaf8] sm:$0xff]  ;;  %v2844_v17 = vld [vmem:[%s6133_s3 + $0xbf0] sm:$0xff] }
 0x190   : > { %3979 = vmatprep.subr.bf16.mxu1 %v3978_v31  ;;  %v5643_v31 = vld [vmem:[%s6131_s1 + $0x68] sm:$0xff]  ;;  %v3962_v8 = vpack.c.bf16 %v2813_v24, %v2812_v18 }
 0x191   : > { %v1900_v14 = vcombine.high %v5643_v31, %v5643_v31 }
 0x192   : > { %3949 = vmatpush3.bf16.msra.mxu0 %v3948_v22  ;;  %v3994_v22 = vpack.c.bf16 %v2845_v26, %v2844_v17 }
 0x193   : > { %3981 = vmatpush3.bf16.msra.mxu1 %v3980_v9  ;;  %3951 = vmatprep.subr.bf16.mxu0 %v3950_v45  ;;  %v2829_v9 = vld [vmem:[%s6133_s3 + $0xb78] sm:$0xff]  ;;  %v2864_v45 = vld [vmem:[%s6133_s3 + $0xc80] sm:$0xff] }
 0x194   : > { %3983 = vmatprep.subr.bf16.mxu1 %v3982_v19  ;;  %v1899_v19 = vcombine.high %v5638_v30, %v5638_v30  ;;  %v3996_v39 = vpack.c.bf16 %v2829_v9, %v2828_v35  ;;  %v3998_v52 = vpack.c.bf16 %v2865_v36, %v2864_v45  ;;  %v2870_v35 = vld [vmem:[%s6133_s3 + $0xcb0] sm:$0xff]  ;;  %v2903_v45 = vld [vmem:[%s6133_s3 + $0xdb8] sm:$0xff] }
 0x195   : > { %v2902_v9 = vld [vmem:[%s6133_s3 + $0xdb0] sm:$0xff] }
 0x196   : > { %3953 = vmatpush3.bf16.msra.mxu0 %v3952_v55  ;;  %v2848_v55 = vld [vmem:[%s6133_s3 + $0xc00] sm:$0xff]  ;;  %v1904_v43 = vadd.f32 %v1899_v19, %v1888_v49  ;;  %v2899_v49 = vld [vmem:[%s6133_s3 + $0xd98] sm:$0xff]  ;;  %v2854_v19 = vld [vmem:[%s6133_s3 + $0xc30] sm:$0xff] }
 0x197   : > { %3985 = vmatpush3.bf16.msra.mxu1 %v3984_v62  ;;  %3955 = vmatprep.subr.bf16.mxu0 %v3954_v46  ;;  %v2849_v62 = vld [vmem:[%s6133_s3 + $0xc08] sm:$0xff]  ;;  %v1666_v46 = vadd.f32 %v5423_v54, %v1653_v44  ;;  %v1906_v54 = vadd.f32 %v1900_v14, %v1896_v57  ;;  %v2851_v57 = vld [vmem:[%s6133_s3 + $0xc18] sm:$0xff]  ;;  %v2886_v14 = vld [vmem:[%s6133_s3 + $0xd30] sm:$0xff] }
 0x198   : > { %3987 = vmatprep.subr.bf16.mxu1 %v3986_v63  ;;  %v4000_v44 = vpack.c.bf16 %v2849_v62, %v2848_v55  ;;  %v2898_v63 = vld [vmem:[%s6133_s3 + $0xd90] sm:$0xff]  ;;  %v1908_v13 = vmax.f32 %v1904_v43, 0.0  ;;  %v4004_v24 = vpack.c.bf16 %v2851_v57, %v2850_v4  ;;  %v2873_v55 = vld [vmem:[%s6133_s3 + $0xcc8] sm:$0xff]  ;;  %v2904_v62 = vld [vmem:[%s6133_s3 + $0xdc0] sm:$0xff]  ;;  %v4044_v41 = vpack.c.bf16 %v2887_v20, %v2886_v14 }
 0x199   : > { %v1670_v29 = vmax.f32 %v1666_v46, 0.0  ;;  %v4034_v15 = vpack.c.bf16 %v2899_v49, %v2898_v63  ;;  %v1910_v18 = vmax.f32 %v1906_v54, 0.0  ;;  %v2905_v46 = vld [vmem:[%s6133_s3 + $0xdc8] sm:$0xff]  ;;  %v2856_v43 = vld [vmem:[%s6133_s3 + $0xc40] sm:$0xff]  ;;  %v2874_v63 = vld [vmem:[%s6133_s3 + $0xcd0] sm:$0xff] }
 0x19a   : > { %3957 = vmatpush3.bf16.msra.mxu0 %v3956_v5  ;;  %v4002_v5 = vpack.c.bf16 %v2867_v60, %v2866_v42  ;;  %v2857_v42 = vld [vmem:[%s6133_s3 + $0xc48] sm:$0xff]  ;;  %v2888_v60 = vld [vmem:[%s6133_s3 + $0xd40] sm:$0xff]  ;;  %v2875_v49 = vld [vmem:[%s6133_s3 + $0xcd8] sm:$0xff] }
 0x19b   : > { %3989 = vmatpush3.bf16.msra.mxu1 %v3988_v6  ;;  %3959 = vmatprep.subr.bf16.mxu0 %v3958_v7  ;;  %v2883_v6 = vld [vmem:[%s6133_s3 + $0xd18] sm:$0xff]  ;;  %v2868_v7 = vld [vmem:[%s6133_s3 + $0xca0] sm:$0xff]  ;;  %v2889_v54 = vld [vmem:[%s6133_s3 + $0xd48] sm:$0xff]  ;;  %v4016_v4 = vpack.c.bf16 %v2857_v42, %v2856_v43 }
 0x19c   : > { %3991 = vmatprep.subr.bf16.mxu1 %v3990_v16  ;;  %v2900_v16 = vld [vmem:[%s6133_s3 + $0xda0] sm:$0xff]  ;;  %v4036_v17 = vpack.c.bf16 %v2883_v6, %v2882_v59  ;;  %v4006_v26 = vpack.c.bf16 %v2869_v10, %v2868_v7  ;;  %v4048_v57 = vpack.c.bf16 %v2889_v54, %v2888_v60  ;;  %v4018_v59 = vpack.c.bf16 %v2875_v49, %v2874_v63  ;;  %v2890_v6 = vld [vmem:[%s6133_s3 + $0xd50] sm:$0xff]  ;;  %v2891_v10 = vld [vmem:[%s6133_s3 + $0xd58] sm:$0xff] }
 0x19d   : > { %v4038_v11 = vpack.c.bf16 %v2901_v47, %v2900_v16  ;;  %v2908_v16 = vld [vmem:[%s6133_s3 + $0xde0] sm:$0xff]  ;;  %v2909_v47 = vld [vmem:[%s6133_s3 + $0xde8] sm:$0xff]  ;;  %v2863_v14 = vld [vmem:[%s6133_s3 + $0xc78] sm:$0xff]  ;;  %v1903_v60 = vadd.f32 %v5638_v30, %v1884_v58  ;;  %v1905_v49 = vadd.f32 %v5643_v31, %v1892_v1 }
 0x19e   : > { %3961 = vmatpush3.bf16.msra.mxu0 %v3960_v27  ;;  %v2852_v27 = vld [vmem:[%s6133_s3 + $0xc20] sm:$0xff]  ;;  %v2915_v63 = vld [vmem:[%s6133_s3 + $0xe08] sm:$0xff] }
 0x19f   : > { %3993 = vmatpush3.bf16.msra.mxu1 %v3992_v33  ;;  %3963 = vmatprep.subr.bf16.mxu0 %v3962_v8  ;;  %v2853_v33 = vld [vmem:[%s6133_s3 + $0xc28] sm:$0xff]  ;;  %v2884_v8 = vld [vmem:[%s6133_s3 + $0xd20] sm:$0xff] }
 0x1a0   : > { %3995 = vmatprep.subr.bf16.mxu1 %v3994_v22  ;;  %v2871_v22 = vld [vmem:[%s6133_s3 + $0xcb8] sm:$0xff]  ;;  %v4008_v36 = vpack.c.bf16 %v2853_v33, %v2852_v27  ;;  %v4040_v12 = vpack.c.bf16 %v2885_v34, %v2884_v8  ;;  %v2861_v27 = vld [vmem:[%s6133_s3 + $0xc68] sm:$0xff]  ;;  %v2892_v33 = vld [vmem:[%s6133_s3 + $0xd60] sm:$0xff]  ;;  %v4054_v8 = vpack.c.bf16 %v2909_v47, %v2908_v16 }
 0x1a1   : > { %v4010_v37 = vpack.c.bf16 %v2871_v22, %v2870_v35  ;;  %v2878_v34 = vld [vmem:[%s6133_s3 + $0xcf0] sm:$0xff]  ;;  %v2879_v35 = vld [vmem:[%s6133_s3 + $0xcf8] sm:$0xff]  ;;  %v2914_v54 = vld [vmem:[%s6133_s3 + $0xe00] sm:$0xff] }
 0x1a2   : > { %3965 = vmatpush3.bf16.msra.mxu0 %v3964_v38  ;;  %v2855_v38 = vld [vmem:[%s6133_s3 + $0xc38] sm:$0xff]  ;;  %v2910_v22 = vld [vmem:[%s6133_s3 + $0xdf0] sm:$0xff]  ;;  %v2946_v58 = vld [vmem:[%s6133_s3 + $0xf00] sm:$0xff]  ;;  %v4064_v1 = vpack.c.bf16 %v2915_v63, %v2914_v54 }
 0x1a3   : > { %3997 = vmatpush3.bf16.msra.mxu1 %v3996_v39  ;;  %3999 = vmatprep.subr.bf16.mxu0 %v3998_v52  ;;  %v4042_v39 = vpack.c.bf16 %v2903_v45, %v2902_v9  ;;  %v2872_v52 = vld [vmem:[%s6133_s3 + $0xcc0] sm:$0xff]  ;;  %v2911_v9 = vld [vmem:[%s6133_s3 + $0xdf8] sm:$0xff]  ;;  %v2947_v30 = vld [vmem:[%s6133_s3 + $0xf08] sm:$0xff] }
 0x1a4   : > { %4031 = vmatprep.subr.bf16.mxu1 %v4030_v53  ;;  %v4012_v53 = vpack.c.bf16 %v2855_v38, %v2854_v19  ;;  %v4014_v28 = vpack.c.bf16 %v2873_v55, %v2872_v52  ;;  %v4026_v19 = vpack.c.bf16 %v2879_v35, %v2878_v34  ;;  %v2862_v38 = vld [vmem:[%s6133_s3 + $0xc70] sm:$0xff]  ;;  %v4058_v20 = vpack.c.bf16 %v2911_v9, %v2910_v22  ;;  %v2895_v52 = vld [vmem:[%s6133_s3 + $0xd78] sm:$0xff]  ;;  %v2930_v55 = vld [vmem:[%s6133_s3 + $0xe80] sm:$0xff] }
 0x1a5   : > { %1802 = vmatmul.mubr.f32.vlgmr.msra.gmra.mrb[12].mxu0 %v1668_v61  ;;  %v2906_v61 = vld [vmem:[%s6133_s3 + $0xdd0] sm:$0xff]  ;;  %v2966_v47 = vld [vmem:[%s6133_s3 + $0xfa0] sm:$0xff]  ;;  %v2951_v35 = vld [vmem:[%s6133_s3 + $0xf28] sm:$0xff] }
 0x1a6   : > { %1872 = vmatmul.mubr.f32.vlgmr.msra.gmra.mrb[12].mxu1 %v1670_v29  ;;  %4001 = vmatpush3.bf16.msra.mxu0 %v4000_v44  ;;  %v4046_v44 = vpack.c.bf16 %v2905_v46, %v2904_v62  ;;  %v2858_v29 = vld [vmem:[%s6133_s3 + $0xc50] sm:$0xff]  ;;  %v2931_v62 = vld [vmem:[%s6133_s3 + $0xe88] sm:$0xff]  ;;  %v2962_v46 = vld [vmem:[%s6133_s3 + $0xf80] sm:$0xff] }
 0x1a7   : > { %2040 = vmatprep.mubr.f32.mxu0 %v1908_v13  ;;  %4033 = vmatpush3.bf16.msra.mxu1 %v4032_v3  ;;  %v2907_v3 = vld [vmem:[%s6133_s3 + $0xdd8] sm:$0xff]  ;;  %v2876_v13 = vld [vmem:[%s6133_s3 + $0xce0] sm:$0xff]  ;;  %v2936_v22 = vld [vmem:[%s6133_s3 + $0xeb0] sm:$0xff] }
 0x1a8   : > { %2110 = vmatprep.mubr.f32.mxu1 %v1910_v18  ;;  %4003 = vmatprep.subr.bf16.mxu0 %v4002_v5  ;;  %v2859_v5 = vld [vmem:[%s6133_s3 + $0xc58] sm:$0xff]  ;;  %v4050_v7 = vpack.c.bf16 %v2907_v3, %v2906_v61  ;;  %v2923_v54 = vld [vmem:[%s6133_s3 + $0xe48] sm:$0xff]  ;;  %v2954_v63 = vld [vmem:[%s6133_s3 + $0xf40] sm:$0xff] }
 0x1a9   : > { %4035 = vmatprep.subr.bf16.mxu1 %v4034_v15  ;;  %v2877_v15 = vld [vmem:[%s6133_s3 + $0xce8] sm:$0xff]  ;;  %v4020_v18 = vpack.c.bf16 %v2859_v5, %v2858_v29  ;;  %v2916_v29 = vld [vmem:[%s6133_s3 + $0xe10] sm:$0xff]  ;;  %v1909_v5 = vmax.f32 %v1905_v49, 0.0  ;;  %v2937_v9 = vld [vmem:[%s6133_s3 + $0xeb8] sm:$0xff] }
 0x1aa   : > { %4005 = vmatpush3.bf16.msra.mxu0 %v4004_v24  ;;  %v4052_v24 = vpack.c.bf16 %v2891_v10, %v2890_v6  ;;  %v2934_v10 = vld [vmem:[%s6133_s3 + $0xea0] sm:$0xff] }
 0x1ab   : > { %4037 = vmatpush3.bf16.msra.mxu1 %v4036_v17  ;;  %4007 = vmatprep.subr.bf16.mxu0 %v4006_v26  ;;  %v4022_v17 = vpack.c.bf16 %v2877_v15, %v2876_v13  ;;  %v2860_v26 = vld [vmem:[%s6133_s3 + $0xc60] sm:$0xff]  ;;  %v2935_v13 = vld [vmem:[%s6133_s3 + $0xea8] sm:$0xff] }
 0x1ac   : > { %4039 = vmatprep.subr.bf16.mxu1 %v4038_v11  ;;  %v2893_v11 = vld [vmem:[%s6133_s3 + $0xd68] sm:$0xff]  ;;  %v4024_v45 = vpack.c.bf16 %v2861_v27, %v2860_v26  ;;  %v4070_v27 = vpack.c.bf16 %v2935_v13, %v2934_v10 }
 0x1ae   : > { %4009 = vmatpush3.bf16.msra.mxu0 %v4008_v36  ;;  %v5858_v36 = vld [vmem:[%s6131_s1 + $0x70] sm:$0xff] }
 0x1af   : > { %4041 = vmatpush3.bf16.msra.mxu1 %v4040_v12  ;;  %4011 = vmatprep.subr.bf16.mxu0 %v4010_v37  ;;  %v5863_v12 = vld [vmem:[%s6131_s1 + $0x78] sm:$0xff]  ;;  %v4056_v37 = vpack.c.bf16 %v2893_v11, %v2892_v33  ;;  %v2918_v33 = vld [vmem:[%s6133_s3 + $0xe20] sm:$0xff] }
 0x1b0   : > { %4043 = vmatprep.subr.bf16.mxu1 %v4042_v39  ;;  %v2894_v39 = vld [vmem:[%s6133_s3 + $0xd70] sm:$0xff]  ;;  %v2139_v43 = vcombine.high %v5863_v12, %v5863_v12  ;;  %v2950_v11 = vld [vmem:[%s6133_s3 + $0xf20] sm:$0xff] }
 0x1b1   : > { %v4060_v42 = vpack.c.bf16 %v2895_v52, %v2894_v39  ;;  %v2920_v39 = vld [vmem:[%s6133_s3 + $0xe30] sm:$0xff] }
 0x1b2   : > { %4013 = vmatpush3.bf16.msra.mxu0 %v4012_v53  ;;  %v2963_v53 = vld [vmem:[%s6133_s3 + $0xf88] sm:$0xff]  ;;  %v2145_v31 = vadd.f32 %v2139_v43, %v2135_v23  ;;  %v2948_v23 = vld [vmem:[%s6133_s3 + $0xf10] sm:$0xff] }
 0x1b3   : > { %4045 = vmatpush3.bf16.msra.mxu1 %v4044_v41  ;;  %4015 = vmatprep.subr.bf16.mxu0 %v4014_v28  ;;  %v2138_v41 = vcombine.high %v5858_v36, %v5858_v36  ;;  %v4028_v28 = vpack.c.bf16 %v2863_v14, %v2862_v38  ;;  %v4094_v61 = vpack.c.bf16 %v2963_v53, %v2962_v46  ;;  %v2952_v52 = vld [vmem:[%s6133_s3 + $0xf30] sm:$0xff]  ;;  %v2938_v46 = vld [vmem:[%s6133_s3 + $0xec0] sm:$0xff]  ;;  %v2939_v53 = vld [vmem:[%s6133_s3 + $0xec8] sm:$0xff] }
 0x1b4   : > { %4047 = vmatprep.subr.bf16.mxu1 %v4046_v44  ;;  %v4062_v44 = vpack.c.bf16 %v2931_v62, %v2930_v55  ;;  %v4104_v38 = vpack.c.bf16 %v2951_v35, %v2950_v11  ;;  %v4074_v14 = vpack.c.bf16 %v2937_v9, %v2936_v22  ;;  %v2953_v62 = vld [vmem:[%s6133_s3 + $0xf38] sm:$0xff]  ;;  %v2976_v11 = vld [vmem:[%s6133_s3 + $0xff0] sm:$0xff] }
 0x1b5   : > { %v2143_v3 = vadd.f32 %v2138_v41, %v2127_v21  ;;  %v1907_v21 = vmax.f32 %v1903_v60, 0.0  ;;  %v2970_v41 = vld [vmem:[%s6133_s3 + $0xfc0] sm:$0xff]  ;;  %v4078_v60 = vpack.c.bf16 %v2939_v53, %v2938_v46  ;;  %v2142_v53 = vadd.f32 %v5858_v36, %v2123_v40 }
 0x1b6   : > { %4017 = vmatpush3.bf16.msra.mxu0 %v4016_v4  ;;  %v2932_v4 = vld [vmem:[%s6133_s3 + $0xe90] sm:$0xff] }
 0x1b7   : > { %4049 = vmatpush3.bf16.msra.mxu1 %v4048_v57  ;;  %4019 = vmatprep.subr.bf16.mxu0 %v4018_v59  ;;  %v2964_v57 = vld [vmem:[%s6133_s3 + $0xf90] sm:$0xff]  ;;  %v4096_v59 = vpack.c.bf16 %v2947_v30, %v2946_v58  ;;  %v4066_v6 = vpack.c.bf16 %v2933_v25, %v2932_v4  ;;  %v2147_v15 = vmax.f32 %v2143_v3, 0.0  ;;  %v2941_v30 = vld [vmem:[%s6133_s3 + $0xed8] sm:$0xff] }
 0x1b8   : > { %4051 = vmatprep.subr.bf16.mxu1 %v4050_v7  ;;  %v2949_v7 = vld [vmem:[%s6133_s3 + $0xf18] sm:$0xff]  ;;  %v4098_v16 = vpack.c.bf16 %v2965_v51, %v2964_v57  ;;  %v2940_v58 = vld [vmem:[%s6133_s3 + $0xed0] sm:$0xff] }
 0x1b9   : > { %v4100_v26 = vpack.c.bf16 %v2949_v7, %v2948_v23  ;;  %v2972_v3 = vld [vmem:[%s6133_s3 + $0xfd0] sm:$0xff]  ;;  %v2973_v4 = vld [vmem:[%s6133_s3 + $0xfd8] sm:$0xff]  ;;  %v2943_v23 = vld [vmem:[%s6133_s3 + $0xee8] sm:$0xff] }
 0x1ba   : > { %4021 = vmatpush3.bf16.msra.mxu0 %v4020_v18  ;;  %v2967_v18 = vld [vmem:[%s6133_s3 + $0xfa8] sm:$0xff]  ;;  %v2924_v57 = vld [vmem:[%s6133_s3 + $0xe50] sm:$0xff]  ;;  %v2925_v51 = vld [vmem:[%s6133_s3 + $0xe58] sm:$0xff] }
 0x1bb   : > { %4053 = vmatpush3.bf16.msra.mxu1 %v4052_v24  ;;  %4023 = vmatprep.subr.bf16.mxu0 %v4022_v17  ;;  %v2149_v24 = vmax.f32 %v2145_v31, 0.0  ;;  %v4068_v17 = vpack.c.bf16 %v2917_v56, %v2916_v29  ;;  %v4102_v34 = vpack.c.bf16 %v2967_v18, %v2966_v47  ;;  %v4082_v31 = vpack.c.bf16 %v2941_v30, %v2940_v58  ;;  %v2957_v29 = vld [vmem:[%s6133_s3 + $0xf58] sm:$0xff]  ;;  %v2942_v56 = vld [vmem:[%s6133_s3 + $0xee0] sm:$0xff] }
 0x1bc   : > { %4055 = vmatprep.subr.bf16.mxu1 %v4054_v8  ;;  %v2919_v8 = vld [vmem:[%s6133_s3 + $0xe28] sm:$0xff]  ;;  %v4084_v7 = vpack.c.bf16 %v2925_v51, %v2924_v57  ;;  %v4086_v13 = vpack.c.bf16 %v2943_v23, %v2942_v56  ;;  %v2958_v47 = vld [vmem:[%s6133_s3 + $0xf60] sm:$0xff] }
 0x1be   : > { %4025 = vmatpush3.bf16.msra.mxu0 %v4024_v45  ;;  %v2968_v45 = vld [vmem:[%s6133_s3 + $0xfb0] sm:$0xff] }
 0x1bf   : > { %4057 = vmatpush3.bf16.msra.mxu1 %v4056_v37  ;;  %4027 = vmatprep.subr.bf16.mxu0 %v4026_v19  ;;  %v2969_v37 = vld [vmem:[%s6133_s3 + $0xfb8] sm:$0xff]  ;;  %v4072_v19 = vpack.c.bf16 %v2919_v8, %v2918_v33 }
 0x1c0   : > { %4059 = vmatprep.subr.bf16.mxu1 %v4058_v20  ;;  %v2921_v20 = vld [vmem:[%s6133_s3 + $0xe38] sm:$0xff]  ;;  %v4106_v55 = vpack.c.bf16 %v2969_v37, %v2968_v45 }
 0x1c1   : > { %v4076_v43 = vpack.c.bf16 %v2921_v20, %v2920_v39  ;;  %v2960_v20 = vld [vmem:[%s6133_s3 + $0xf70] sm:$0xff] }
 0x1c2   : > { %4029 = vmatpush3.bf16.msra.mxu0 %v4028_v28  ;;  %v2971_v28 = vld [vmem:[%s6133_s3 + $0xfc8] sm:$0xff] }
 0x1c3   : > { %4061 = vmatpush3.bf16.msra.mxu1 %v4060_v42  ;;  %4063 = vmatprep.subr.bf16.mxu0 %v4062_v44  ;;  %v4108_v42 = vpack.c.bf16 %v2953_v62, %v2952_v52  ;;  %v2922_v44 = vld [vmem:[%s6133_s3 + $0xe40] sm:$0xff]  ;;  %v4110_v49 = vpack.c.bf16 %v2971_v28, %v2970_v41  ;;  %v2961_v52 = vld [vmem:[%s6133_s3 + $0xf78] sm:$0xff]  ;;  %v2144_v41 = vadd.f32 %v5863_v12, %v2131_v32  ;;  %v2146_v28 = vmax.f32 %v2142_v53, 0.0 }
 0x1c4   : > { %4095 = vmatprep.subr.bf16.mxu1 %v4094_v61  ;;  %v2955_v61 = vld [vmem:[%s6133_s3 + $0xf48] sm:$0xff]  ;;  %v4080_v25 = vpack.c.bf16 %v2923_v54, %v2922_v44  ;;  %v4124_v46 = vpack.c.bf16 %v2961_v52, %v2960_v20 }
 0x1c5   : > { %2041 = vmatmul.mubr.f32.vlgmr.msra.gmra.mrb[14].mxu0 %v1907_v21  ;;  %v2956_v21 = vld [vmem:[%s6133_s3 + $0xf50] sm:$0xff] }
 0x1c6   : > { %2111 = vmatmul.mubr.f32.vlgmr.msra.gmra.mrb[14].mxu1 %v1909_v5  ;;  %4065 = vmatpush3.bf16.msra.mxu0 %v4064_v1  ;;  %v4112_v1 = vpack.c.bf16 %v2955_v61, %v2954_v63  ;;  %v2974_v5 = vld [vmem:[%s6133_s3 + $0xfe0] sm:$0xff]  ;;  %v4116_v10 = vpack.c.bf16 %v2957_v29, %v2956_v21 }
 0x1c7   : > { %2279 = vmatprep.mubr.f32.mxu0 %v2147_v15  ;;  %4097 = vmatpush3.bf16.msra.mxu1 %v4096_v59  ;;  %v4114_v59 = vpack.c.bf16 %v2973_v4, %v2972_v3  ;;  %v2926_v15 = vld [vmem:[%s6133_s3 + $0xe60] sm:$0xff]  ;;  %v2366_v4 = vld [vmem:[%s6135_s5 + $0x8] sm:$0xff] }
 0x1c8   : > { %2349 = vmatprep.mubr.f32.mxu1 %v2149_v24  ;;  %4067 = vmatprep.subr.bf16.mxu0 %v4066_v6  ;;  %v2975_v6 = vld [vmem:[%s6133_s3 + $0xfe8] sm:$0xff]  ;;  %v2365_v3 = vld [vmem:[%s6135_s5] sm:$0xff] }
 0x1c9   : > { %4099 = vmatprep.subr.bf16.mxu1 %v4098_v16  ;;  %v2927_v16 = vld [vmem:[%s6133_s3 + $0xe68] sm:$0xff]  ;;  %v4118_v24 = vpack.c.bf16 %v2975_v6, %v2974_v5  ;;  %v2367_v5 = vld [vmem:[%s6135_s5 + $0x10] sm:$0xff]  ;;  %v2368_v6 = vld [vmem:[%s6135_s5 + $0x18] sm:$0xff] }
 0x1ca   : > { %4069 = vmatpush3.bf16.msra.mxu0 %v4068_v17  ;;  %v2959_v17 = vld [vmem:[%s6133_s3 + $0xf68] sm:$0xff]  ;;  %v4088_v9 = vpack.c.bf16 %v2927_v16, %v2926_v15  ;;  %v2371_v16 = vld [vmem:[%s6135_s5 + $0x30] sm:$0xff] }
 0x1cb   : > { %4101 = vmatpush3.bf16.msra.mxu1 %v4100_v26  ;;  %4071 = vmatprep.subr.bf16.mxu0 %v4070_v27  ;;  %v2944_v26 = vld [vmem:[%s6133_s3 + $0xef0] sm:$0xff]  ;;  %v2945_v27 = vld [vmem:[%s6133_s3 + $0xef8] sm:$0xff]  ;;  %v4120_v37 = vpack.c.bf16 %v2959_v17, %v2958_v47 }
 0x1cc   : > { %4103 = vmatprep.subr.bf16.mxu1 %v4102_v34  ;;  %v2977_v34 = vld [vmem:[%s6133_s3 + $0xff8] sm:$0xff] }
 0x1cd   : > { %v4122_v39 = vpack.c.bf16 %v2977_v34, %v2976_v11  ;;  %v2372_v47 = vld [vmem:[%s6135_s5 + $0x38] sm:$0xff] }
 0x1ce   : > { %4073 = vmatpush3.bf16.msra.mxu0 %v4072_v19  ;;  %v4090_v19 = vpack.c.bf16 %v2945_v27, %v2944_v26 }
 0x1cf   : > { %4105 = vmatpush3.bf16.msra.mxu1 %v4104_v38  ;;  %4075 = vmatprep.subr.bf16.mxu0 %v4074_v14  ;;  %v2928_v38 = vld [vmem:[%s6133_s3 + $0xe70] sm:$0xff]  ;;  %v2929_v14 = vld [vmem:[%s6133_s3 + $0xe78] sm:$0xff] }
 0x1d0   : > { %4107 = vmatprep.subr.bf16.mxu1 %v4106_v55  ;;  %v4092_v62 = vpack.c.bf16 %v2929_v14, %v2928_v38 }
 0x1d2   : > { %4077 = vmatpush3.bf16.msra.mxu0 %v4076_v43  ;;  %v2148_v43 = vmax.f32 %v2144_v41, 0.0 }
 0x1d3   : > { %4109 = vmatpush3.bf16.msra.mxu1 %v4108_v42  ;;  %4079 = vmatprep.subr.bf16.mxu0 %v4078_v60 }
 0x1d4   : > { %4111 = vmatprep.subr.bf16.mxu1 %v4110_v49 }
 0x1d6   : > { %4081 = vmatpush3.bf16.msra.mxu0 %v4080_v25  ;;  %v4177_v25 = vmov 0.0|0.0  }
 0x1d7   : > { %4113 = vmatpush3.bf16.msra.mxu1 %v4112_v1  ;;  %4083 = vmatprep.subr.bf16.mxu0 %v4082_v31  ;;  %v4127_v1 = vpack.c.bf16 %v2366_v4, %v2365_v3 }
 0x1d8   : > { %v3014_v18 = vpop.f32.mrb[2].mxu0  ;;  %4115 = vmatprep.subr.bf16.mxu1 %v4114_v59 }
 0x1d9   : > { %v3049_v33 = vpop.f32.mrb[2].mxu1  ;;  %v3015_v8 = vpop.f32.mrb[3].mxu0 }
 0x1da   : > { %v3016_v35 = vadd.f32 %v3015_v8, %v3014_v18  ;;  %v3050_v22 = vpop.f32.mrb[3].mxu1  ;;  %4085 = vmatpush3.bf16.msra.mxu0 %v4084_v7  ;;  %v2369_v7 = vld [vmem:[%s6135_s5 + $0x20] sm:$0xff]  ;;  %v4136_v18 = vpack.c.bf16 %v2372_v47, %v2371_v16 }
 0x1db   : > { %v3051_v45 = vadd.f32 %v3050_v22, %v3049_v33  ;;  %4117 = vmatpush3.bf16.msra.mxu1 %v4116_v10  ;;  %4087 = vmatprep.subr.bf16.mxu0 %v4086_v13  ;;  %v4130_v10 = vpack.c.bf16 %v2368_v6, %v2367_v5  ;;  %v2370_v13 = vld [vmem:[%s6135_s5 + $0x28] sm:$0xff] }
 0x1dc   : > { %4119 = vmatprep.subr.bf16.mxu1 %v4118_v24  ;;  %v4133_v15 = vpack.c.bf16 %v2370_v13, %v2369_v7 }
 0x1dd   : > { %v779_v55 = vadd.f32 %v3051_v45, %v3016_v35 }
 0x1de   : > { %4089 = vmatpush3.bf16.msra.mxu0 %v4088_v9 }
 0x1df   : > { %4121 = vmatpush3.bf16.msra.mxu1 %v4120_v37  ;;  %4091 = vmatprep.subr.bf16.mxu0 %v4090_v19 }
 0x1e0   : > { %4123 = vmatprep.subr.bf16.mxu1 %v4122_v39 }
 0x1e2   : > { %4093 = vmatpush3.bf16.msra.mxu0 %v4092_v62 }
 0x1e3   : > { %4125 = vmatpush3.bf16.msra.mxu1 %v4124_v46  ;;  %4126 = vmatprep.subr.bf16.mxu0 %v4177_v25 }
 0x1e5   : > { %2280 = vmatmul.mubr.f32.vlgmr.msra.gmra.mrb[16].mxu0 %v2146_v28 }
 0x1e6   : > { %2350 = vmatmul.mubr.f32.vlgmr.msra.gmra.mrb[16].mxu1 %v2148_v43  ;;  %4128 = vmatpush3.bf16.msra.mxu0 %v4127_v1 }
 0x1e7   : > { %4129 = vmatprep.subr.bf16.mxu0 %v4177_v25  ;;  %3567 = vmatprep.mubr.msk.f32.mxu0 %vm4178_vm4, %v4175_v0 }
 0x1ea   : > { %4131 = vmatpush3.bf16.msra.mxu0 %v4130_v10 }
 0x1eb   : > { %4132 = vmatprep.subr.bf16.mxu0 %v4177_v25 }
 0x1ee   : > { %4134 = vmatpush3.bf16.msra.mxu0 %v4133_v15 }
 0x1ef   : > { %4135 = vmatprep.subr.bf16.mxu0 %v4177_v25 }
 0x1f2   : > { %4137 = vmatpush3.bf16.msra.mxu0 %v4136_v18 }
 0x1f8   : > { %v3084_v42 = vpop.f32.mrb[4].mxu0 }
 0x1f9   : > { %v3119_v60 = vpop.f32.mrb[4].mxu1  ;;  %v3085_v44 = vpop.f32.mrb[5].mxu0 }
 0x1fa   : > { %v3086_v54 = vadd.f32 %v3085_v44, %v3084_v42  ;;  %v3120_v63 = vpop.f32.mrb[5].mxu1 }
 0x1fb   : > { %v3121_v48 = vadd.f32 %v3120_v63, %v3119_v60  ;;  %v2978_v63 = vld [vmem:[%s6134_s4] ss:$0 sm:$0xff] }
 0x1fc   : > { %v849_v49 = vadd.f32 %v3086_v54, %v779_v55 }
 0x1fe   : > { %v919_v40 = vadd.f32 %v3121_v48, %v849_v49 }
 0x218   : > { %v3154_v36 = vpop.f32.mrb[6].mxu0 }
 0x219   : > { %v3189_v61 = vpop.f32.mrb[6].mxu1  ;;  %v3155_v58 = vpop.f32.mrb[7].mxu0 }
 0x21a   : > { %v3156_v50 = vadd.f32 %v3155_v58, %v3154_v36  ;;  %v3190_v2 = vpop.f32.mrb[7].mxu1 }
 0x21b   : > { %v3191_v32 = vadd.f32 %v3190_v2, %v3189_v61 }
 0x21d   : > { %v1157_v12 = vadd.f32 %v3191_v32, %v3156_v50 }
 0x21f   : > { %v1160_v30 = vadd.f32 %v1157_v12, %v919_v40 }
 0x238   : > { %v3224_v31 = vpop.f32.mrb[8].mxu0 }
 0x239   : > { %v3259_v57 = vpop.f32.mrb[8].mxu1  ;;  %v3225_v51 = vpop.f32.mrb[9].mxu0 }
 0x23a   : > { %v3226_v21 = vadd.f32 %v3225_v51, %v3224_v31  ;;  %v3260_v59 = vpop.f32.mrb[9].mxu1 }
 0x23b   : > { %v3261_v29 = vadd.f32 %v3260_v59, %v3259_v57 }
 0x23d   : > { %v1396_v56 = vadd.f32 %v3261_v29, %v3226_v21 }
 0x23f   : > { %v1399_v23 = vadd.f32 %v1396_v56, %v1160_v30 }
 0x258   : > { %v3294_v24 = vpop.f32.mrb[10].mxu0 }
 0x259   : > { %v3329_v17 = vpop.f32.mrb[10].mxu1  ;;  %v3295_v26 = vpop.f32.mrb[11].mxu0 }
 0x25a   : > { %v3296_v27 = vadd.f32 %v3295_v26, %v3294_v24  ;;  %v3330_v0 = vpop.f32.mrb[11].mxu1 }
 0x25b   : > { %v3331_v33 = vadd.f32 %v3330_v0, %v3329_v17 }
 0x25d   : > { %v1635_v8 = vadd.f32 %v3331_v33, %v3296_v27 }
 0x25f   : > { %v1638_v11 = vadd.f32 %v1635_v8, %v1399_v23 }
 0x278   : > { %v3364_v34 = vpop.f32.mrb[12].mxu0 }
 0x279   : > { %v3399_v35 = vpop.f32.mrb[12].mxu1  ;;  %v3365_v22 = vpop.f32.mrb[13].mxu0 }
 0x27a   : > { %v3366_v9 = vadd.f32 %v3365_v22, %v3364_v34  ;;  %v3400_v45 = vpop.f32.mrb[13].mxu1 }
 0x27b   : > { %v3401_v37 = vadd.f32 %v3400_v45, %v3399_v35 }
 0x27d   : > { %v1874_v19 = vadd.f32 %v3401_v37, %v3366_v9 }
 0x27f   : > { %v1877_v38 = vadd.f32 %v1874_v19, %v1638_v11 }
 0x298   : > { %v3434_v14 = vpop.f32.mrb[14].mxu0 }
 0x299   : > { %v3469_v39 = vpop.f32.mrb[14].mxu1  ;;  %v3435_v20 = vpop.f32.mrb[15].mxu0 }
 0x29a   : > { %v3436_v52 = vadd.f32 %v3435_v20, %v3434_v14  ;;  %v3470_v55 = vpop.f32.mrb[15].mxu1 }
 0x29b   : > { %v3471_v62 = vadd.f32 %v3470_v55, %v3469_v39 }
 0x29d   : > { %v2113_v46 = vadd.f32 %v3471_v62, %v3436_v52 }
 0x29f   : > { %v2116_v53 = vadd.f32 %v2113_v46, %v1877_v38 }
 0x2b8   : > { %v3504_v41 = vpop.f32.mrb[16].mxu0 }
 0x2b9   : > { %v3539_v28 = vpop.f32.mrb[16].mxu1  ;;  %v3505_v43 = vpop.f32.mrb[17].mxu0 }
 0x2ba   : > { %v3506_v42 = vadd.f32 %v3505_v43, %v3504_v41  ;;  %v3540_v60 = vpop.f32.mrb[17].mxu1 }
 0x2bb   : > { %v3541_v44 = vadd.f32 %v3540_v60, %v3539_v28 }
 0x2bd   : > { %v2352_v54 = vadd.f32 %v3541_v44, %v3506_v42 }
 0x2bf   : > { %v2355_v48 = vadd.f32 %v2352_v54, %v2116_v53 }
 0x2c1   : > { %v2363_v49 = vadd.f32 %v2978_v63, %v2355_v48 }
 0x2c3   : > { %v2364_v40 = vmax.f32 %v2363_v49, 0.0 }
 0x2c5   : > { %3568 = vmatmul.mubr.msk.f32.vlgmr.msra.gmra.mrb[18].mxu0 %vm2373_vm5, %v2364_v40 }
 0x398   : > { %v2443_v36 = vpop.f32.mrb[18].mxu0 }
 0x399   : > { %v2448_v61 = vsel %vm2447_vm6, %v2443_v36, -inf  ;;  %v3569_v58 = vpop.f32.mrb[19].mxu0 }
 0x39a   : > { %v2449_v50 = vrot.slane %v2448_v61, 4 }
 0x39c   : > { %v2450_v2 = vmax.f32 %v2448_v61, %v2449_v50 }
 0x39e   : > { %v2451_v32 = vrot.slane %v2450_v2, 2 }
 0x3a0   : > { %v2452_v12 = vmax.f32 %v2450_v2, %v2451_v32 }
 0x3a2   : > { %v2453_v30 = vrot.slane %v2452_v12, 1 }
 0x3a4   : > { %v2454_v3 = vmax.f32 %v2452_v12, %v2453_v30 }
 0x3a6   : > { %2456 = vst.msk [vmem:[%s247_s27] sm:$0x1] %vm2455_vm7, %v2454_v3 }
 0x3a7 PF: > { %s16_s21 = sadd.s32 1, %s4173_s21  }
 0x3a8   : > { %p13_p4 = scmp.ge.s32.totalorder %s16_s21, 4  }
 0x3aa   :  { %15 = sbr.rel (!%p13_p4) target bundleno = 1 (0x1), region = 88 }

</bundles_post_ra>
